<compile_context>
chip_gen: v6e
topology: v6e:2x2x1
jax: 0.10.0
libtpu: 0.0.40
codegen_flags: <defaults>
</compile_context>

<pallas_src>
import functools

import jax
import jax.numpy as jnp
from jax.experimental import pallas as pl
from jax.experimental.pallas import tpu as pltpu


# nn.PReLU() default init. Kept static (baked into the kernel) on purpose.
# TODO(synk): a learnable per-type alpha would have to become a kernel operand.
_PRELU_ALPHA = 0.25


# ----------------------------------------------------------------------------
# Padding helpers (lane-dense layout at the pallas_call boundary)
# ----------------------------------------------------------------------------
def _rup(n, m):
    return ((n + m - 1) // m) * m


def _pad2(x, rows, cols):
    return jnp.pad(x, ((0, rows - x.shape[0]), (0, cols - x.shape[1])))


# ----------------------------------------------------------------------------
# Pallas kernels (the compute hot path)
# ----------------------------------------------------------------------------
def _chain_kernel(x_ref, *refs, n_layers, acts, alphas):
    """Fused chain: h = x; for each layer: h = act(h @ W_l + b_l).

    refs layout: (W_0, b_0, W_1, b_1, ..., W_{L-1}, b_{L-1}, out_ref).
    Matmul operands are cast to bf16 (f32 accumulation via
    preferred_element_type); activations stay in f32 (v5e has no bf16 VPU/EUP).
    acts / alphas are static Python tuples, so PReLU alpha is baked in.
    """
    h = x_ref[...].astype(jnp.bfloat16)
    for l in range(n_layers):
        w = refs[2 * l][...].astype(jnp.bfloat16)
        b = refs[2 * l + 1][...]                       # (1, N) f32, broadcast
        y = jnp.dot(h, w, preferred_element_type=jnp.float32) + b
        act = acts[l]
        if act == "gelu":
            # TODO(synk): jax.nn.gelu default is the tanh approximation;
            #             torch.nn.GELU uses exact erf (tiny numeric mismatch).
            y = jax.nn.gelu(y)
        elif act == "prelu":
            y = jnp.where(y >= 0.0, y, alphas[l] * y)
        h = y.astype(jnp.bfloat16) if l + 1 < n_layers else y
    refs[-1][...] = h.astype(refs[-1].dtype)


def pallas_dense_chain(x, layers):
    """Fused linear chain in a single pallas_call.

    layers: list of (W, b_or_None, act_or_None, alpha_or_None).
    Inputs are zero-padded to lane-dense shapes; the result is sliced back.
    Rows are tiled over a "parallel" grid axis when M is large; weight blocks
    have constant index_maps so they stay resident across grid steps.
    """
    x = jnp.asarray(x, jnp.float32)
    M, K0 = x.shape
    dims = [K0] + [jnp.asarray(w).shape[1] for (w, _, _, _) in layers]
    dims_p = [_rup(d, 128) for d in dims]

    if M <= 512:
        bm = _rup(M, 8)
        Mp = bm
    else:
        # TODO(synk): for very wide layers a VMEM-aware bm choice (or
        #             vmem_limit_bytes bump) would be needed on v7x (64 MiB).
        bm = 256
        Mp = _rup(M, 256)

    xp = _pad2(x, Mp, dims_p[0])
    operands = [xp]
    in_specs = [pl.BlockSpec((bm, dims_p[0]), lambda i: (i, 0))]
    acts, alphas = [], []
    for li, (W, b, act, alpha) in enumerate(layers):
        W = jnp.asarray(W, jnp.float32)
        Kp, Np = dims_p[li], dims_p[li + 1]
        Wp = _pad2(W, Kp, Np)
        if b is None:
            bp = jnp.zeros((1, Np), jnp.float32)
        else:
            bp = _pad2(jnp.asarray(b, jnp.float32).reshape(1, -1), 1, Np)
        operands += [Wp, bp]
        in_specs += [pl.BlockSpec((Kp, Np), lambda i: (0, 0)),
                     pl.BlockSpec((1, Np), lambda i: (0, 0))]
        acts.append(act)
        alphas.append(0.0 if alpha is None else float(alpha))

    n_layers = len(layers)
    flops = sum(2 * Mp * dims_p[i] * dims_p[i + 1] for i in range(n_layers))
    trans = sum(Mp * dims_p[i + 1] for i, a in enumerate(acts) if a == "gelu")
    bytes_acc = 4 * (Mp * dims_p[0] + Mp * dims_p[-1]
                     + sum(dims_p[i] * dims_p[i + 1] + dims_p[i + 1]
                           for i in range(n_layers)))

    out = pl.pallas_call(
        functools.partial(_chain_kernel, n_layers=n_layers,
                          acts=tuple(acts), alphas=tuple(alphas)),
        out_shape=jax.ShapeDtypeStruct((Mp, dims_p[-1]), jnp.float32),
        grid=(Mp // bm,),
        in_specs=in_specs,
        out_specs=pl.BlockSpec((bm, dims_p[-1]), lambda i: (i, 0)),
        compiler_params=pltpu.CompilerParams(
            dimension_semantics=("parallel",)),
        cost_estimate=pl.CostEstimate(flops=int(flops),
                                      transcendentals=int(trans),
                                      bytes_accessed=int(bytes_acc)),
    )(*operands)
    return out[:M, :dims[-1]]


def _gram_kernel_single(x_ref, o_ref):
    a = x_ref[...].astype(jnp.bfloat16)
    # A @ A.T expressed as a contraction on axis 1 of the SAME operand
    # (single input DMA, no explicit transpose / XLU traffic).
    o_ref[...] = jax.lax.dot_general(
        a, a, (((1,), (1,)), ((), ())), preferred_element_type=jnp.float32)


def _gram_kernel_tiled(xrow_ref, xall_ref, o_ref):
    a = xrow_ref[...].astype(jnp.bfloat16)
    b = xall_ref[...].astype(jnp.bfloat16)
    o_ref[...] = jax.lax.dot_general(
        a, b, (((1,), (1,)), ((), ())), preferred_element_type=jnp.float32)


def pallas_gram(x):
    """recon_adj = x @ x.T, lane-dense padded, row-tiled for large N."""
    x = jnp.asarray(x, jnp.float32)
    M, K = x.shape
    Kp = _rup(K, 128)

    if M <= 512:
        Mp = _rup(M, 128)                 # lane-dense output columns
        xp = _pad2(x, Mp, Kp)
        out = pl.pallas_call(
            _gram_kernel_single,
            out_shape=jax.ShapeDtypeStruct((Mp, Mp), jnp.float32),
            grid=(1,),
            in_specs=[pl.BlockSpec((Mp, Kp), lambda i: (0, 0))],
            out_specs=pl.BlockSpec((Mp, Mp), lambda i: (0, 0)),
            cost_estimate=pl.CostEstimate(
                flops=int(2 * Mp * Mp * Kp), transcendentals=0,
                bytes_accessed=int(4 * (Mp * Kp + Mp * Mp))),
        )(xp)
        return out[:M, :M]

    # TODO(synk): for very large N a 2-D output grid would bound VMEM tighter
    #             (v7x 64 MiB); row-tiling with the full matrix resident is
    #             sufficient for the sizes exercised here.
    bm = 256
    Mp = _rup(M, 256)
    xp = _pad2(x, Mp, Kp)
    out = pl.pallas_call(
        _gram_kernel_tiled,
        out_shape=jax.ShapeDtypeStruct((Mp, Mp), jnp.float32),
        grid=(Mp // bm,),
        in_specs=[pl.BlockSpec((bm, Kp), lambda i: (i, 0)),
                  pl.BlockSpec((Mp, Kp), lambda i: (0, 0))],
        out_specs=pl.BlockSpec((bm, Mp), lambda i: (i, 0)),
        compiler_params=pltpu.CompilerParams(
            dimension_semantics=("parallel",)),
        cost_estimate=pl.CostEstimate(
            flops=int(2 * Mp * Mp * Kp), transcendentals=0,
            bytes_accessed=int(4 * (2 * Mp * Kp + Mp * Mp))),
    )(xp, xp)
    return out[:M, :M]


# ----------------------------------------------------------------------------
# Deterministic parameter construction (mirrors HGMAE.__init__ shapes)
# ----------------------------------------------------------------------------
def _glorot(key, shape, scale=0.1):
    return scale * jax.random.normal(key, shape, dtype=jnp.float32)


def init_params(key, ntypes, in_dim, hidden_dim, out_dim):
    keys = iter(jax.random.split(key, 256))
    p = {}
    # mask tokens (initialised to zeros, as in the PyTorch module)
    p["m_mask_token"] = {t: jnp.zeros((1, in_dim[t]), jnp.float32) for t in ntypes}
    p["dm_mask_token"] = {t: jnp.zeros((1, out_dim[t]), jnp.float32) for t in ntypes}

    def gnn_params(dims_in, dims_out):
        g = {"W_in": {}, "b_in": {}, "W_out": {}, "b_out": {}}
        for t in ntypes:
            g["W_in"][t] = _glorot(next(keys), (dims_in[t], hidden_dim))
            g["b_in"][t] = jnp.zeros((hidden_dim,), jnp.float32)
            g["W_out"][t] = _glorot(next(keys), (hidden_dim, dims_out[t]))
            g["b_out"][t] = jnp.zeros((dims_out[t],), jnp.float32)
        return g

    # GNN_encoder: in_dim -> out_dim ; GNN_decoder: out_dim -> in_dim
    p["encoder"] = gnn_params(in_dim, out_dim)
    p["decoder"] = gnn_params(out_dim, in_dim)

    # projections: Linear(in_dim[t] -> 64) applied to decoder output (in_dim[t])
    p["proj_W"] = {t: _glorot(next(keys), (in_dim[t], 64)) for t in ntypes}
    p["proj_b"] = {t: jnp.zeros((64,), jnp.float32) for t in ntypes}

    # MLP_decoder: Linear(out,out)+PReLU, Linear(out,out)+PReLU, Linear(out,128)
    p["mlp"] = {}
    for t in ntypes:
        d = out_dim[t]
        p["mlp"][t] = {
            "W1": _glorot(next(keys), (d, d)), "b1": jnp.zeros((d,), jnp.float32),
            "W2": _glorot(next(keys), (d, d)), "b2": jnp.zeros((d,), jnp.float32),
            "W3": _glorot(next(keys), (d, 128)), "b3": jnp.zeros((128,), jnp.float32),
        }

    # enc_to_dec_{tar,mer}: Linear(out,out, bias=False)
    p["enc_to_dec_tar"] = {t: _glorot(next(keys), (out_dim[t], out_dim[t])) for t in ntypes}
    p["enc_to_dec_mer"] = {t: _glorot(next(keys), (out_dim[t], out_dim[t])) for t in ntypes}
    return p


# ----------------------------------------------------------------------------
# Stand-in heterogeneous GNN (single layer) — fused Pallas kernels
#   * src-side linear hoisted (computed once per src, optional pre-linear fused)
#   * per dst: ONE kernel: (A_cat @ X_cat) @ W_out + b_out [@ post linears]
# ----------------------------------------------------------------------------
def gnn_forward(adj_blocks, H, gp, ntypes, pre_W=None, post_layers=None):
    Xs = {}
    for src in ntypes:
        layers = []
        if pre_W is not None:                      # fused enc_to_dec (bias-free)
            layers.append((pre_W[src], None, None, None))
        layers.append((gp["W_in"][src], gp["b_in"][src], "gelu", None))
        Xs[src] = pallas_dense_chain(H[src], layers)
    X_cat = jnp.concatenate([Xs[s] for s in ntypes], axis=0)     # (N_total, hidden)

    out = {}
    for dst in ntypes:
        A_cat = jnp.concatenate([adj_blocks[(dst, s)] for s in ntypes], axis=1)
        layers = [(X_cat, None, None, None),                     # A_cat @ X_cat
                  (gp["W_out"][dst], gp["b_out"][dst], None, None)]
        if post_layers is not None:
            layers = layers + list(post_layers[dst])
        out[dst] = pallas_dense_chain(A_cat, layers)
    return out


# ----------------------------------------------------------------------------
# Masking glue (plain JAX; not a hot path)
# ----------------------------------------------------------------------------
def drop_edge(key, adj_blocks, p):
    out = {}
    for i, (k, A) in enumerate(sorted(adj_blocks.items())):
        mask = jax.random.bernoulli(jax.random.fold_in(key, i), 1.0 - p, A.shape)
        out[k] = A * mask.astype(A.dtype)
    return out


def tar_masking(key, X, mask_rate, mask_token, leave_unchanged, replace_rate):
    N, D = X.shape
    num_mask = int(mask_rate * N)
    perm = jax.random.permutation(jax.random.fold_in(key, 0), N)
    mask_idx, keep_idx = perm[:num_mask], perm[num_mask:]
    n_unchanged = int(leave_unchanged * num_mask)
    n_replace = int(replace_rate * num_mask)
    n_token = num_mask - n_unchanged - n_replace
    token_idx = mask_idx[:n_token]
    replace_idx = mask_idx[n_token:n_token + n_replace]
    out = X
    out = out.at[token_idx].set(jnp.broadcast_to(mask_token, (n_token, D)))
    if n_replace > 0:
        src = jax.random.randint(jax.random.fold_in(key, 1), (n_replace,), 0, N)
        out = out.at[replace_idx].set(X[src])
    return out, (mask_idx, keep_idx)


# ----------------------------------------------------------------------------
# HGMAE forward (training semantics, deterministic RNG)
# ----------------------------------------------------------------------------
def hgmae_forward(key, adj_blocks, H, params, *, ntypes, tar_mask_rate,
                  leave_unchanged, replace_rate, drop_rate, training=True):
    k_drop, k_mask = jax.random.split(key)

    G_masked = drop_edge(k_drop, adj_blocks, drop_rate) if training else adj_blocks

    # --- metapath / edge-reconstruction branch -------------------------------
    H1 = gnn_forward(G_masked, H, params["encoder"], ntypes)
    # H2 = GNN_decoder(G_masked, enc_to_dec_mer(H1)); projection(H2) fused in.
    proj = gnn_forward(
        G_masked, H1, params["decoder"], ntypes,
        pre_W=params["enc_to_dec_mer"],
        post_layers={t: [(params["proj_W"][t], params["proj_b"][t], None, None)]
                     for t in ntypes})

    masked_attr, masked_idx = {}, {}
    for i, t in enumerate(ntypes):                     # iterate like H2.items()
        m_attr, (m_idx, _) = tar_masking(
            jax.random.fold_in(k_mask, i), H[t], tar_mask_rate,
            params["m_mask_token"][t], leave_unchanged, replace_rate)
        masked_attr[t] = m_attr
        masked_idx[t] = m_idx
    # TODO(synk): torch.isnan(H2).any() raise is omitted (no in-trace raise).

    H_emb = jnp.concatenate([proj[t] for t in ntypes], axis=0)
    recon_adj = pallas_gram(H_emb)                     # H_emb @ H_emb.T

    # --- target-attribute-reconstruction branch ------------------------------
    # H3 = enc_to_dec_tar(GNN_encoder(G, masked_attr)) — tar linear fused in.
    H3 = gnn_forward(
        adj_blocks, masked_attr, params["encoder"], ntypes,
        post_layers={t: [(params["enc_to_dec_tar"][t], None, None, None)]
                     for t in ntypes})

    H3_tilde = {}
    for t in ntypes:
        emb = H3[t]
        if training:
            n_m = masked_idx[t].shape[0]
            emb = emb.at[masked_idx[t]].set(
                jnp.broadcast_to(params["dm_mask_token"][t], (n_m, emb.shape[1])))
        H3_tilde[t] = emb
    Z = gnn_forward(adj_blocks, H3_tilde, params["decoder"], ntypes)

    # 3-layer MLP decoder fused into one kernel per node type.
    P_tilde = {}
    for t in ntypes:
        mp = params["mlp"][t]
        P_tilde[t] = pallas_dense_chain(
            H3[t],
            [(mp["W1"], mp["b1"], "prelu", _PRELU_ALPHA),
             (mp["W2"], mp["b2"], "prelu", _PRELU_ALPHA),
             (mp["W3"], mp["b3"], None, None)])

    return recon_adj, Z, masked_idx, P_tilde


def build_forward(ntypes, tar_mask_rate, leave_unchanged, replace_rate,
                  drop_rate, training=True):
    """One jit over the whole forward: static hyperparams closed over, only
    (key, adj_blocks, H, params) traced -> single dispatch for all kernels."""
    fwd = functools.partial(
        hgmae_forward, ntypes=tuple(ntypes), tar_mask_rate=tar_mask_rate,
        leave_unchanged=leave_unchanged, replace_rate=replace_rate,
        drop_rate=drop_rate, training=training)
    return jax.jit(fwd)


# ----------------------------------------------------------------------------
if __name__ == "__main__":
    ntypes = ["author", "paper"]
    in_dim = {"author": 24, "paper": 32}
    out_dim = {"author": 16, "paper": 20}
    hidden_dim = 32
    n_nodes = {"author": 12, "paper": 14}
    leave_unchanged, replace_rate, drop_rate = 0.1, 0.1, 0.5
    tar_mask_rate = 0.5

    root = jax.random.PRNGKey(0)
    k_param, k_feat, k_adj, k_fwd = jax.random.split(root, 4)

    params = init_params(k_param, ntypes, in_dim, hidden_dim, out_dim)

    # Node features
    H = {t: jax.random.normal(jax.random.fold_in(k_feat, i),
                              (n_nodes[t], in_dim[t]), dtype=jnp.float32)
         for i, t in enumerate(ntypes)}

    # Dense per-type-pair adjacency blocks (row-normalised, nonnegative)
    adj_blocks = {}
    for i, dst in enumerate(ntypes):
        for j, src in enumerate(ntypes):
            a = jax.random.uniform(jax.random.fold_in(k_adj, 10 * i + j),
                                   (n_nodes[dst], n_nodes[src]), dtype=jnp.float32)
            adj_blocks[(dst, src)] = a / jnp.sum(a, axis=1, keepdims=True)

    forward = build_forward(ntypes, tar_mask_rate, leave_unchanged,
                            replace_rate, drop_rate, training=True)
    recon_adj, Z, masked_idx, P_tilde = forward(k_fwd, adj_blocks, H, params)

    jax.block_until_ready(recon_adj)
    for t in ntypes:
        jax.block_until_ready(Z[t])
        jax.block_until_ready(P_tilde[t])

    n_total = sum(n_nodes.values())
    assert recon_adj.shape == (n_total, n_total)
    assert all(Z[t].shape == (n_nodes[t], in_dim[t]) for t in ntypes)
    assert all(P_tilde[t].shape == (n_nodes[t], 128) for t in ntypes)
    assert not bool(jnp.isnan(recon_adj).any())

    print("KERNEL_OK")
</pallas_src>

<mosaic_0001>
module attributes {stable_mosaic.version = 11 : i64} {
  func.func @_chain_kernel(%arg0: i32, %arg1: memref<16x128xf32, #tpu.memory_space<vmem>>, %arg2: memref<128x128xf32, #tpu.memory_space<vmem>>, %arg3: memref<1x128xf32, #tpu.memory_space<vmem>>, %arg4: memref<16x128xf32, #tpu.memory_space<vmem>>) attributes {dimension_semantics = [#tpu.dimension_semantics<parallel>], iteration_bounds = array<i64: 1>, scalar_prefetch = 0 : i64, scratch_operands = 0 : i64, tpu.core_type = #tpu.core_type<tc>, window_params = [{transform_indices = @transform_0, window_bounds = array<i64: 16, 128>}, {pipeline_mode = #tpu.pipeline_mode<synchronous>, transform_indices = @transform_1, window_bounds = array<i64: 128, 128>}, {pipeline_mode = #tpu.pipeline_mode<synchronous>, transform_indices = @transform_2, window_bounds = array<i64: 1, 128>}, {transform_indices = @transform_3, window_bounds = array<i64: 16, 128>}]} {
    %c0 = arith.constant 0 : index
    %c0_0 = arith.constant 0 : index
    %0 = vector.load %arg1[%c0, %c0_0] : memref<16x128xf32, #tpu.memory_space<vmem>>, vector<16x128xf32>
    %1 = arith.truncf %0 : vector<16x128xf32> to vector<16x128xbf16>
    %c0_1 = arith.constant 0 : index
    %c0_2 = arith.constant 0 : index
    %2 = vector.load %arg2[%c0_1, %c0_2] : memref<128x128xf32, #tpu.memory_space<vmem>>, vector<128x128xf32>
    %3 = arith.truncf %2 : vector<128x128xf32> to vector<128x128xbf16>
    %c0_3 = arith.constant 0 : index
    %c0_4 = arith.constant 0 : index
    %4 = vector.load %arg3[%c0_3, %c0_4] : memref<1x128xf32, #tpu.memory_space<vmem>>, vector<1x128xf32>
    %cst = arith.constant dense<0.000000e+00> : vector<16x128xf32>
    %5 = tpu.matmul %1, %3, %cst {dimension_numbers = #tpu.dot_dimension_numbers<[1], [0], [0], [1], [0, 0, 1, 1], [], []>} : vector<16x128xbf16>, vector<128x128xbf16>, vector<16x128xf32> -> vector<16x128xf32>
    %6 = vector.broadcast %4 : vector<1x128xf32> to vector<16x128xf32>
    %7 = arith.addf %5, %6 : vector<16x128xf32>
    %8 = arith.mulf %7, %7 : vector<16x128xf32>
    %9 = arith.mulf %7, %8 : vector<16x128xf32>
    %cst_5 = arith.constant 4.471500e-02 : f32
    %10 = vector.broadcast %cst_5 : f32 to vector<16x128xf32>
    %11 = arith.mulf %10, %9 : vector<16x128xf32>
    %12 = arith.addf %7, %11 : vector<16x128xf32>
    %cst_6 = arith.constant 0.797884583 : f32
    %13 = vector.broadcast %cst_6 : f32 to vector<16x128xf32>
    %14 = arith.mulf %13, %12 : vector<16x128xf32>
    %15 = math.tanh %14 : vector<16x128xf32>
    %cst_7 = arith.constant 1.000000e+00 : f32
    %16 = vector.broadcast %cst_7 : f32 to vector<16x128xf32>
    %17 = arith.addf %16, %15 : vector<16x128xf32>
    %cst_8 = arith.constant 5.000000e-01 : f32
    %18 = vector.broadcast %cst_8 : f32 to vector<16x128xf32>
    %19 = arith.mulf %18, %17 : vector<16x128xf32>
    %20 = arith.mulf %7, %19 : vector<16x128xf32>
    %c0_9 = arith.constant 0 : index
    %c0_10 = arith.constant 0 : index
    %21 = vector.load %arg4[%c0_9, %c0_10] : memref<16x128xf32, #tpu.memory_space<vmem>>, vector<16x128xf32>
    tpu.vector_store %arg4[%c0_9, %c0_10], %20 {strides = array<i32>} : memref<16x128xf32, #tpu.memory_space<vmem>>, vector<16x128xf32>,
    return
  }
  func.func @transform_0(%arg0: i32) -> (i32, i32) {
    %c0_i32 = arith.constant 0 : i32
    %c0_i32_0 = arith.constant 0 : i32
    return %arg0, %c0_i32 : i32, i32
  }
  func.func @transform_1(%arg0: i32) -> (i32, i32) {
    %c0_i32 = arith.constant 0 : i32
    %c0_i32_0 = arith.constant 0 : i32
    %c0_i32_1 = arith.constant 0 : i32
    return %c0_i32, %c0_i32_0 : i32, i32
  }
  func.func @transform_2(%arg0: i32) -> (i32, i32) {
    %c0_i32 = arith.constant 0 : i32
    %c0_i32_0 = arith.constant 0 : i32
    %c0_i32_1 = arith.constant 0 : i32
    return %c0_i32, %c0_i32_0 : i32, i32
  }
  func.func @transform_3(%arg0: i32) -> (i32, i32) {
    %c0_i32 = arith.constant 0 : i32
    %c0_i32_0 = arith.constant 0 : i32
    return %arg0, %c0_i32 : i32, i32
  }
}

module attributes {stable_mosaic.version = 11 : i64} {
  func.func @_chain_kernel(%arg0: i32, %arg1: memref<16x128xf32, #tpu.memory_space<vmem>>, %arg2: memref<128x128xf32, #tpu.memory_space<vmem>>, %arg3: memref<1x128xf32, #tpu.memory_space<vmem>>, %arg4: memref<128x128xf32, #tpu.memory_space<vmem>>, %arg5: memref<1x128xf32, #tpu.memory_space<vmem>>, %arg6: memref<16x128xf32, #tpu.memory_space<vmem>>) attributes {dimension_semantics = [#tpu.dimension_semantics<parallel>], iteration_bounds = array<i64: 1>, scalar_prefetch = 0 : i64, scratch_operands = 0 : i64, tpu.core_type = #tpu.core_type<tc>, window_params = [{transform_indices = @transform_0, window_bounds = array<i64: 16, 128>}, {pipeline_mode = #tpu.pipeline_mode<synchronous>, transform_indices = @transform_1, window_bounds = array<i64: 128, 128>}, {pipeline_mode = #tpu.pipeline_mode<synchronous>, transform_indices = @transform_2, window_bounds = array<i64: 1, 128>}, {pipeline_mode = #tpu.pipeline_mode<synchronous>, transform_indices = @transform_3, window_bounds = array<i64: 128, 128>}, {pipeline_mode = #tpu.pipeline_mode<synchronous>, transform_indices = @transform_4, window_bounds = array<i64: 1, 128>}, {transform_indices = @transform_5, window_bounds = array<i64: 16, 128>}]} {
    %c0 = arith.constant 0 : index
    %c0_0 = arith.constant 0 : index
    %0 = vector.load %arg1[%c0, %c0_0] : memref<16x128xf32, #tpu.memory_space<vmem>>, vector<16x128xf32>
    %1 = arith.truncf %0 : vector<16x128xf32> to vector<16x128xbf16>
    %c0_1 = arith.constant 0 : index
    %c0_2 = arith.constant 0 : index
    %2 = vector.load %arg2[%c0_1, %c0_2] : memref<128x128xf32, #tpu.memory_space<vmem>>, vector<128x128xf32>
    %3 = arith.truncf %2 : vector<128x128xf32> to vector<128x128xbf16>
    %c0_3 = arith.constant 0 : index
    %c0_4 = arith.constant 0 : index
    %4 = vector.load %arg3[%c0_3, %c0_4] : memref<1x128xf32, #tpu.memory_space<vmem>>, vector<1x128xf32>
    %cst = arith.constant dense<0.000000e+00> : vector<16x128xf32>
    %5 = tpu.matmul %1, %3, %cst {dimension_numbers = #tpu.dot_dimension_numbers<[1], [0], [0], [1], [0, 0, 1, 1], [], []>} : vector<16x128xbf16>, vector<128x128xbf16>, vector<16x128xf32> -> vector<16x128xf32>
    %6 = vector.broadcast %4 : vector<1x128xf32> to vector<16x128xf32>
    %7 = arith.addf %5, %6 : vector<16x128xf32>
    %8 = arith.truncf %7 : vector<16x128xf32> to vector<16x128xbf16>
    %c0_5 = arith.constant 0 : index
    %c0_6 = arith.constant 0 : index
    %9 = vector.load %arg4[%c0_5, %c0_6] : memref<128x128xf32, #tpu.memory_space<vmem>>, vector<128x128xf32>
    %10 = arith.truncf %9 : vector<128x128xf32> to vector<128x128xbf16>
    %c0_7 = arith.constant 0 : index
    %c0_8 = arith.constant 0 : index
    %11 = vector.load %arg5[%c0_7, %c0_8] : memref<1x128xf32, #tpu.memory_space<vmem>>, vector<1x128xf32>
    %cst_9 = arith.constant dense<0.000000e+00> : vector<16x128xf32>
    %12 = tpu.matmul %8, %10, %cst_9 {dimension_numbers = #tpu.dot_dimension_numbers<[1], [0], [0], [1], [0, 0, 1, 1], [], []>} : vector<16x128xbf16>, vector<128x128xbf16>, vector<16x128xf32> -> vector<16x128xf32>
    %13 = vector.broadcast %11 : vector<1x128xf32> to vector<16x128xf32>
    %14 = arith.addf %12, %13 : vector<16x128xf32>
    %c0_10 = arith.constant 0 : index
    %c0_11 = arith.constant 0 : index
    %15 = vector.load %arg6[%c0_10, %c0_11] : memref<16x128xf32, #tpu.memory_space<vmem>>, vector<16x128xf32>
    tpu.vector_store %arg6[%c0_10, %c0_11], %14 {strides = array<i32>} : memref<16x128xf32, #tpu.memory_space<vmem>>, vector<16x128xf32>,
    return
  }
  func.func @transform_0(%arg0: i32) -> (i32, i32) {
    %c0_i32 = arith.constant 0 : i32
    %c0_i32_0 = arith.constant 0 : i32
    return %arg0, %c0_i32 : i32, i32
  }
  func.func @transform_1(%arg0: i32) -> (i32, i32) {
    %c0_i32 = arith.constant 0 : i32
    %c0_i32_0 = arith.constant 0 : i32
    %c0_i32_1 = arith.constant 0 : i32
    return %c0_i32, %c0_i32_0 : i32, i32
  }
  func.func @transform_2(%arg0: i32) -> (i32, i32) {
    %c0_i32 = arith.constant 0 : i32
    %c0_i32_0 = arith.constant 0 : i32
    %c0_i32_1 = arith.constant 0 : i32
    return %c0_i32, %c0_i32_0 : i32, i32
  }
  func.func @transform_3(%arg0: i32) -> (i32, i32) {
    %c0_i32 = arith.constant 0 : i32
    %c0_i32_0 = arith.constant 0 : i32
    %c0_i32_1 = arith.constant 0 : i32
    return %c0_i32, %c0_i32_0 : i32, i32
  }
  func.func @transform_4(%arg0: i32) -> (i32, i32) {
    %c0_i32 = arith.constant 0 : i32
    %c0_i32_0 = arith.constant 0 : i32
    %c0_i32_1 = arith.constant 0 : i32
    return %c0_i32, %c0_i32_0 : i32, i32
  }
  func.func @transform_5(%arg0: i32) -> (i32, i32) {
    %c0_i32 = arith.constant 0 : i32
    %c0_i32_0 = arith.constant 0 : i32
    return %arg0, %c0_i32 : i32, i32
  }
}

module attributes {stable_mosaic.version = 11 : i64} {
  func.func @_chain_kernel(%arg0: i32, %arg1: memref<16x128xf32, #tpu.memory_space<vmem>>, %arg2: memref<128x128xf32, #tpu.memory_space<vmem>>, %arg3: memref<1x128xf32, #tpu.memory_space<vmem>>, %arg4: memref<128x128xf32, #tpu.memory_space<vmem>>, %arg5: memref<1x128xf32, #tpu.memory_space<vmem>>, %arg6: memref<16x128xf32, #tpu.memory_space<vmem>>) attributes {dimension_semantics = [#tpu.dimension_semantics<parallel>], iteration_bounds = array<i64: 1>, scalar_prefetch = 0 : i64, scratch_operands = 0 : i64, tpu.core_type = #tpu.core_type<tc>, window_params = [{transform_indices = @transform_0, window_bounds = array<i64: 16, 128>}, {pipeline_mode = #tpu.pipeline_mode<synchronous>, transform_indices = @transform_1, window_bounds = array<i64: 128, 128>}, {pipeline_mode = #tpu.pipeline_mode<synchronous>, transform_indices = @transform_2, window_bounds = array<i64: 1, 128>}, {pipeline_mode = #tpu.pipeline_mode<synchronous>, transform_indices = @transform_3, window_bounds = array<i64: 128, 128>}, {pipeline_mode = #tpu.pipeline_mode<synchronous>, transform_indices = @transform_4, window_bounds = array<i64: 1, 128>}, {transform_indices = @transform_5, window_bounds = array<i64: 16, 128>}]} {
    %c0 = arith.constant 0 : index
    %c0_0 = arith.constant 0 : index
    %0 = vector.load %arg1[%c0, %c0_0] : memref<16x128xf32, #tpu.memory_space<vmem>>, vector<16x128xf32>
    %1 = arith.truncf %0 : vector<16x128xf32> to vector<16x128xbf16>
    %c0_1 = arith.constant 0 : index
    %c0_2 = arith.constant 0 : index
    %2 = vector.load %arg2[%c0_1, %c0_2] : memref<128x128xf32, #tpu.memory_space<vmem>>, vector<128x128xf32>
    %3 = arith.truncf %2 : vector<128x128xf32> to vector<128x128xbf16>
    %c0_3 = arith.constant 0 : index
    %c0_4 = arith.constant 0 : index
    %4 = vector.load %arg3[%c0_3, %c0_4] : memref<1x128xf32, #tpu.memory_space<vmem>>, vector<1x128xf32>
    %cst = arith.constant dense<0.000000e+00> : vector<16x128xf32>
    %5 = tpu.matmul %1, %3, %cst {dimension_numbers = #tpu.dot_dimension_numbers<[1], [0], [0], [1], [0, 0, 1, 1], [], []>} : vector<16x128xbf16>, vector<128x128xbf16>, vector<16x128xf32> -> vector<16x128xf32>
    %6 = vector.broadcast %4 : vector<1x128xf32> to vector<16x128xf32>
    %7 = arith.addf %5, %6 : vector<16x128xf32>
    %8 = arith.truncf %7 : vector<16x128xf32> to vector<16x128xbf16>
    %c0_5 = arith.constant 0 : index
    %c0_6 = arith.constant 0 : index
    %9 = vector.load %arg4[%c0_5, %c0_6] : memref<128x128xf32, #tpu.memory_space<vmem>>, vector<128x128xf32>
    %10 = arith.truncf %9 : vector<128x128xf32> to vector<128x128xbf16>
    %c0_7 = arith.constant 0 : index
    %c0_8 = arith.constant 0 : index
    %11 = vector.load %arg5[%c0_7, %c0_8] : memref<1x128xf32, #tpu.memory_space<vmem>>, vector<1x128xf32>
    %cst_9 = arith.constant dense<0.000000e+00> : vector<16x128xf32>
    %12 = tpu.matmul %8, %10, %cst_9 {dimension_numbers = #tpu.dot_dimension_numbers<[1], [0], [0], [1], [0, 0, 1, 1], [], []>} : vector<16x128xbf16>, vector<128x128xbf16>, vector<16x128xf32> -> vector<16x128xf32>
    %13 = vector.broadcast %11 : vector<1x128xf32> to vector<16x128xf32>
    %14 = arith.addf %12, %13 : vector<16x128xf32>
    %15 = arith.mulf %14, %14 : vector<16x128xf32>
    %16 = arith.mulf %14, %15 : vector<16x128xf32>
    %cst_10 = arith.constant 4.471500e-02 : f32
    %17 = vector.broadcast %cst_10 : f32 to vector<16x128xf32>
    %18 = arith.mulf %17, %16 : vector<16x128xf32>
    %19 = arith.addf %14, %18 : vector<16x128xf32>
    %cst_11 = arith.constant 0.797884583 : f32
    %20 = vector.broadcast %cst_11 : f32 to vector<16x128xf32>
    %21 = arith.mulf %20, %19 : vector<16x128xf32>
    %22 = math.tanh %21 : vector<16x128xf32>
    %cst_12 = arith.constant 1.000000e+00 : f32
    %23 = vector.broadcast %cst_12 : f32 to vector<16x128xf32>
    %24 = arith.addf %23, %22 : vector<16x128xf32>
    %cst_13 = arith.constant 5.000000e-01 : f32
    %25 = vector.broadcast %cst_13 : f32 to vector<16x128xf32>
    %26 = arith.mulf %25, %24 : vector<16x128xf32>
    %27 = arith.mulf %14, %26 : vector<16x128xf32>
    %c0_14 = arith.constant 0 : index
    %c0_15 = arith.constant 0 : index
    %28 = vector.load %arg6[%c0_14, %c0_15] : memref<16x128xf32, #tpu.memory_space<vmem>>, vector<16x128xf32>
    tpu.vector_store %arg6[%c0_14, %c0_15], %27 {strides = array<i32>} : memref<16x128xf32, #tpu.memory_space<vmem>>, vector<16x128xf32>,
    return
  }
  func.func @transform_0(%arg0: i32) -> (i32, i32) {
    %c0_i32 = arith.constant 0 : i32
    %c0_i32_0 = arith.constant 0 : i32
    return %arg0, %c0_i32 : i32, i32
  }
  func.func @transform_1(%arg0: i32) -> (i32, i32) {
    %c0_i32 = arith.constant 0 : i32
    %c0_i32_0 = arith.constant 0 : i32
    %c0_i32_1 = arith.constant 0 : i32
    return %c0_i32, %c0_i32_0 : i32, i32
  }
  func.func @transform_2(%arg0: i32) -> (i32, i32) {
    %c0_i32 = arith.constant 0 : i32
    %c0_i32_0 = arith.constant 0 : i32
    %c0_i32_1 = arith.constant 0 : i32
    return %c0_i32, %c0_i32_0 : i32, i32
  }
  func.func @transform_3(%arg0: i32) -> (i32, i32) {
    %c0_i32 = arith.constant 0 : i32
    %c0_i32_0 = arith.constant 0 : i32
    %c0_i32_1 = arith.constant 0 : i32
    return %c0_i32, %c0_i32_0 : i32, i32
  }
  func.func @transform_4(%arg0: i32) -> (i32, i32) {
    %c0_i32 = arith.constant 0 : i32
    %c0_i32_0 = arith.constant 0 : i32
    %c0_i32_1 = arith.constant 0 : i32
    return %c0_i32, %c0_i32_0 : i32, i32
  }
  func.func @transform_5(%arg0: i32) -> (i32, i32) {
    %c0_i32 = arith.constant 0 : i32
    %c0_i32_0 = arith.constant 0 : i32
    return %arg0, %c0_i32 : i32, i32
  }
}

module attributes {stable_mosaic.version = 11 : i64} {
  func.func @_chain_kernel(%arg0: i32, %arg1: memref<16x128xf32, #tpu.memory_space<vmem>>, %arg2: memref<128x128xf32, #tpu.memory_space<vmem>>, %arg3: memref<1x128xf32, #tpu.memory_space<vmem>>, %arg4: memref<128x128xf32, #tpu.memory_space<vmem>>, %arg5: memref<1x128xf32, #tpu.memory_space<vmem>>, %arg6: memref<128x128xf32, #tpu.memory_space<vmem>>, %arg7: memref<1x128xf32, #tpu.memory_space<vmem>>, %arg8: memref<16x128xf32, #tpu.memory_space<vmem>>) attributes {dimension_semantics = [#tpu.dimension_semantics<parallel>], iteration_bounds = array<i64: 1>, scalar_prefetch = 0 : i64, scratch_operands = 0 : i64, tpu.core_type = #tpu.core_type<tc>, window_params = [{transform_indices = @transform_0, window_bounds = array<i64: 16, 128>}, {pipeline_mode = #tpu.pipeline_mode<synchronous>, transform_indices = @transform_1, window_bounds = array<i64: 128, 128>}, {pipeline_mode = #tpu.pipeline_mode<synchronous>, transform_indices = @transform_2, window_bounds = array<i64: 1, 128>}, {pipeline_mode = #tpu.pipeline_mode<synchronous>, transform_indices = @transform_3, window_bounds = array<i64: 128, 128>}, {pipeline_mode = #tpu.pipeline_mode<synchronous>, transform_indices = @transform_4, window_bounds = array<i64: 1, 128>}, {pipeline_mode = #tpu.pipeline_mode<synchronous>, transform_indices = @transform_5, window_bounds = array<i64: 128, 128>}, {pipeline_mode = #tpu.pipeline_mode<synchronous>, transform_indices = @transform_6, window_bounds = array<i64: 1, 128>}, {transform_indices = @transform_7, window_bounds = array<i64: 16, 128>}]} {
    %c0 = arith.constant 0 : index
    %c0_0 = arith.constant 0 : index
    %0 = vector.load %arg1[%c0, %c0_0] : memref<16x128xf32, #tpu.memory_space<vmem>>, vector<16x128xf32>
    %1 = arith.truncf %0 : vector<16x128xf32> to vector<16x128xbf16>
    %c0_1 = arith.constant 0 : index
    %c0_2 = arith.constant 0 : index
    %2 = vector.load %arg2[%c0_1, %c0_2] : memref<128x128xf32, #tpu.memory_space<vmem>>, vector<128x128xf32>
    %3 = arith.truncf %2 : vector<128x128xf32> to vector<128x128xbf16>
    %c0_3 = arith.constant 0 : index
    %c0_4 = arith.constant 0 : index
    %4 = vector.load %arg3[%c0_3, %c0_4] : memref<1x128xf32, #tpu.memory_space<vmem>>, vector<1x128xf32>
    %cst = arith.constant dense<0.000000e+00> : vector<16x128xf32>
    %5 = tpu.matmul %1, %3, %cst {dimension_numbers = #tpu.dot_dimension_numbers<[1], [0], [0], [1], [0, 0, 1, 1], [], []>} : vector<16x128xbf16>, vector<128x128xbf16>, vector<16x128xf32> -> vector<16x128xf32>
    %6 = vector.broadcast %4 : vector<1x128xf32> to vector<16x128xf32>
    %7 = arith.addf %5, %6 : vector<16x128xf32>
    %8 = arith.truncf %7 : vector<16x128xf32> to vector<16x128xbf16>
    %c0_5 = arith.constant 0 : index
    %c0_6 = arith.constant 0 : index
    %9 = vector.load %arg4[%c0_5, %c0_6] : memref<128x128xf32, #tpu.memory_space<vmem>>, vector<128x128xf32>
    %10 = arith.truncf %9 : vector<128x128xf32> to vector<128x128xbf16>
    %c0_7 = arith.constant 0 : index
    %c0_8 = arith.constant 0 : index
    %11 = vector.load %arg5[%c0_7, %c0_8] : memref<1x128xf32, #tpu.memory_space<vmem>>, vector<1x128xf32>
    %cst_9 = arith.constant dense<0.000000e+00> : vector<16x128xf32>
    %12 = tpu.matmul %8, %10, %cst_9 {dimension_numbers = #tpu.dot_dimension_numbers<[1], [0], [0], [1], [0, 0, 1, 1], [], []>} : vector<16x128xbf16>, vector<128x128xbf16>, vector<16x128xf32> -> vector<16x128xf32>
    %13 = vector.broadcast %11 : vector<1x128xf32> to vector<16x128xf32>
    %14 = arith.addf %12, %13 : vector<16x128xf32>
    %15 = arith.truncf %14 : vector<16x128xf32> to vector<16x128xbf16>
    %c0_10 = arith.constant 0 : index
    %c0_11 = arith.constant 0 : index
    %16 = vector.load %arg6[%c0_10, %c0_11] : memref<128x128xf32, #tpu.memory_space<vmem>>, vector<128x128xf32>
    %17 = arith.truncf %16 : vector<128x128xf32> to vector<128x128xbf16>
    %c0_12 = arith.constant 0 : index
    %c0_13 = arith.constant 0 : index
    %18 = vector.load %arg7[%c0_12, %c0_13] : memref<1x128xf32, #tpu.memory_space<vmem>>, vector<1x128xf32>
    %cst_14 = arith.constant dense<0.000000e+00> : vector<16x128xf32>
    %19 = tpu.matmul %15, %17, %cst_14 {dimension_numbers = #tpu.dot_dimension_numbers<[1], [0], [0], [1], [0, 0, 1, 1], [], []>} : vector<16x128xbf16>, vector<128x128xbf16>, vector<16x128xf32> -> vector<16x128xf32>
    %20 = vector.broadcast %18 : vector<1x128xf32> to vector<16x128xf32>
    %21 = arith.addf %19, %20 : vector<16x128xf32>
    %c0_15 = arith.constant 0 : index
    %c0_16 = arith.constant 0 : index
    %22 = vector.load %arg8[%c0_15, %c0_16] : memref<16x128xf32, #tpu.memory_space<vmem>>, vector<16x128xf32>
    tpu.vector_store %arg8[%c0_15, %c0_16], %21 {strides = array<i32>} : memref<16x128xf32, #tpu.memory_space<vmem>>, vector<16x128xf32>,
    return
  }
  func.func @transform_0(%arg0: i32) -> (i32, i32) {
    %c0_i32 = arith.constant 0 : i32
    %c0_i32_0 = arith.constant 0 : i32
    return %arg0, %c0_i32 : i32, i32
  }
  func.func @transform_1(%arg0: i32) -> (i32, i32) {
    %c0_i32 = arith.constant 0 : i32
    %c0_i32_0 = arith.constant 0 : i32
    %c0_i32_1 = arith.constant 0 : i32
    return %c0_i32, %c0_i32_0 : i32, i32
  }
  func.func @transform_2(%arg0: i32) -> (i32, i32) {
    %c0_i32 = arith.constant 0 : i32
    %c0_i32_0 = arith.constant 0 : i32
    %c0_i32_1 = arith.constant 0 : i32
    return %c0_i32, %c0_i32_0 : i32, i32
  }
  func.func @transform_3(%arg0: i32) -> (i32, i32) {
    %c0_i32 = arith.constant 0 : i32
    %c0_i32_0 = arith.constant 0 : i32
    %c0_i32_1 = arith.constant 0 : i32
    return %c0_i32, %c0_i32_0 : i32, i32
  }
  func.func @transform_4(%arg0: i32) -> (i32, i32) {
    %c0_i32 = arith.constant 0 : i32
    %c0_i32_0 = arith.constant 0 : i32
    %c0_i32_1 = arith.constant 0 : i32
    return %c0_i32, %c0_i32_0 : i32, i32
  }
  func.func @transform_5(%arg0: i32) -> (i32, i32) {
    %c0_i32 = arith.constant 0 : i32
    %c0_i32_0 = arith.constant 0 : i32
    %c0_i32_1 = arith.constant 0 : i32
    return %c0_i32, %c0_i32_0 : i32, i32
  }
  func.func @transform_6(%arg0: i32) -> (i32, i32) {
    %c0_i32 = arith.constant 0 : i32
    %c0_i32_0 = arith.constant 0 : i32
    %c0_i32_1 = arith.constant 0 : i32
    return %c0_i32, %c0_i32_0 : i32, i32
  }
  func.func @transform_7(%arg0: i32) -> (i32, i32) {
    %c0_i32 = arith.constant 0 : i32
    %c0_i32_0 = arith.constant 0 : i32
    return %arg0, %c0_i32 : i32, i32
  }
}

module attributes {stable_mosaic.version = 11 : i64} {
  func.func @_gram_kernel_single(%arg0: i32, %arg1: memref<128x128xf32, #tpu.memory_space<vmem>>, %arg2: memref<128x128xf32, #tpu.memory_space<vmem>>) attributes {dimension_semantics = [#tpu.dimension_semantics<arbitrary>], iteration_bounds = array<i64: 1>, scalar_prefetch = 0 : i64, scratch_operands = 0 : i64, tpu.core_type = #tpu.core_type<tc>, window_params = [{pipeline_mode = #tpu.pipeline_mode<synchronous>, transform_indices = @transform_0, window_bounds = array<i64: 128, 128>}, {pipeline_mode = #tpu.pipeline_mode<synchronous>, transform_indices = @transform_1, window_bounds = array<i64: 128, 128>}]} {
    %c0 = arith.constant 0 : index
    %c0_0 = arith.constant 0 : index
    %0 = vector.load %arg1[%c0, %c0_0] : memref<128x128xf32, #tpu.memory_space<vmem>>, vector<128x128xf32>
    %1 = arith.truncf %0 : vector<128x128xf32> to vector<128x128xbf16>
    %cst = arith.constant dense<0.000000e+00> : vector<128x128xf32>
    %2 = tpu.matmul %1, %1, %cst {dimension_numbers = #tpu.dot_dimension_numbers<[1], [1], [0], [0], [0, 0, 1, 0], [], []>} : vector<128x128xbf16>, vector<128x128xbf16>, vector<128x128xf32> -> vector<128x128xf32>
    %c0_1 = arith.constant 0 : index
    %c0_2 = arith.constant 0 : index
    %3 = vector.load %arg2[%c0_1, %c0_2] : memref<128x128xf32, #tpu.memory_space<vmem>>, vector<128x128xf32>
    tpu.vector_store %arg2[%c0_1, %c0_2], %2 {strides = array<i32>} : memref<128x128xf32, #tpu.memory_space<vmem>>, vector<128x128xf32>,
    return
  }
  func.func @transform_0(%arg0: i32) -> (i32, i32) {
    %c0_i32 = arith.constant 0 : i32
    %c0_i32_0 = arith.constant 0 : i32
    %c0_i32_1 = arith.constant 0 : i32
    return %c0_i32, %c0_i32_0 : i32, i32
  }
  func.func @transform_1(%arg0: i32) -> (i32, i32) {
    %c0_i32 = arith.constant 0 : i32
    %c0_i32_0 = arith.constant 0 : i32
    %c0_i32_1 = arith.constant 0 : i32
    return %c0_i32, %c0_i32_0 : i32, i32
  }
}

module attributes {stable_mosaic.version = 11 : i64} {
  func.func @_chain_kernel(%arg0: i32, %arg1: memref<16x128xf32, #tpu.memory_space<vmem>>, %arg2: memref<128x128xf32, #tpu.memory_space<vmem>>, %arg3: memref<1x128xf32, #tpu.memory_space<vmem>>, %arg4: memref<128x128xf32, #tpu.memory_space<vmem>>, %arg5: memref<1x128xf32, #tpu.memory_space<vmem>>, %arg6: memref<16x128xf32, #tpu.memory_space<vmem>>) attributes {dimension_semantics = [#tpu.dimension_semantics<parallel>], iteration_bounds = array<i64: 1>, scalar_prefetch = 0 : i64, scratch_operands = 0 : i64, tpu.core_type = #tpu.core_type<tc>, window_params = [{transform_indices = @transform_0, window_bounds = array<i64: 16, 128>}, {pipeline_mode = #tpu.pipeline_mode<synchronous>, transform_indices = @transform_1, window_bounds = array<i64: 128, 128>}, {pipeline_mode = #tpu.pipeline_mode<synchronous>, transform_indices = @transform_2, window_bounds = array<i64: 1, 128>}, {pipeline_mode = #tpu.pipeline_mode<synchronous>, transform_indices = @transform_3, window_bounds = array<i64: 128, 128>}, {pipeline_mode = #tpu.pipeline_mode<synchronous>, transform_indices = @transform_4, window_bounds = array<i64: 1, 128>}, {transform_indices = @transform_5, window_bounds = array<i64: 16, 128>}]} {
    %c0 = arith.constant 0 : index
    %c0_0 = arith.constant 0 : index
    %0 = vector.load %arg1[%c0, %c0_0] : memref<16x128xf32, #tpu.memory_space<vmem>>, vector<16x128xf32>
    %1 = arith.truncf %0 : vector<16x128xf32> to vector<16x128xbf16>
    %c0_1 = arith.constant 0 : index
    %c0_2 = arith.constant 0 : index
    %2 = vector.load %arg2[%c0_1, %c0_2] : memref<128x128xf32, #tpu.memory_space<vmem>>, vector<128x128xf32>
    %3 = arith.truncf %2 : vector<128x128xf32> to vector<128x128xbf16>
    %c0_3 = arith.constant 0 : index
    %c0_4 = arith.constant 0 : index
    %4 = vector.load %arg3[%c0_3, %c0_4] : memref<1x128xf32, #tpu.memory_space<vmem>>, vector<1x128xf32>
    %cst = arith.constant dense<0.000000e+00> : vector<16x128xf32>
    %5 = tpu.matmul %1, %3, %cst {dimension_numbers = #tpu.dot_dimension_numbers<[1], [0], [0], [1], [0, 0, 1, 1], [], []>} : vector<16x128xbf16>, vector<128x128xbf16>, vector<16x128xf32> -> vector<16x128xf32>
    %6 = vector.broadcast %4 : vector<1x128xf32> to vector<16x128xf32>
    %7 = arith.addf %5, %6 : vector<16x128xf32>
    %8 = arith.truncf %7 : vector<16x128xf32> to vector<16x128xbf16>
    %c0_5 = arith.constant 0 : index
    %c0_6 = arith.constant 0 : index
    %9 = vector.load %arg4[%c0_5, %c0_6] : memref<128x128xf32, #tpu.memory_space<vmem>>, vector<128x128xf32>
    %10 = arith.truncf %9 : vector<128x128xf32> to vector<128x128xbf16>
    %c0_7 = arith.constant 0 : index
    %c0_8 = arith.constant 0 : index
    %11 = vector.load %arg5[%c0_7, %c0_8] : memref<1x128xf32, #tpu.memory_space<vmem>>, vector<1x128xf32>
    %cst_9 = arith.constant dense<0.000000e+00> : vector<16x128xf32>
    %12 = tpu.matmul %8, %10, %cst_9 {dimension_numbers = #tpu.dot_dimension_numbers<[1], [0], [0], [1], [0, 0, 1, 1], [], []>} : vector<16x128xbf16>, vector<128x128xbf16>, vector<16x128xf32> -> vector<16x128xf32>
    %13 = vector.broadcast %11 : vector<1x128xf32> to vector<16x128xf32>
    %14 = arith.addf %12, %13 : vector<16x128xf32>
    %c0_10 = arith.constant 0 : index
    %c0_11 = arith.constant 0 : index
    %15 = vector.load %arg6[%c0_10, %c0_11] : memref<16x128xf32, #tpu.memory_space<vmem>>, vector<16x128xf32>
    tpu.vector_store %arg6[%c0_10, %c0_11], %14 {strides = array<i32>} : memref<16x128xf32, #tpu.memory_space<vmem>>, vector<16x128xf32>,
    return
  }
  func.func @transform_0(%arg0: i32) -> (i32, i32) {
    %c0_i32 = arith.constant 0 : i32
    %c0_i32_0 = arith.constant 0 : i32
    return %arg0, %c0_i32 : i32, i32
  }
  func.func @transform_1(%arg0: i32) -> (i32, i32) {
    %c0_i32 = arith.constant 0 : i32
    %c0_i32_0 = arith.constant 0 : i32
    %c0_i32_1 = arith.constant 0 : i32
    return %c0_i32, %c0_i32_0 : i32, i32
  }
  func.func @transform_2(%arg0: i32) -> (i32, i32) {
    %c0_i32 = arith.constant 0 : i32
    %c0_i32_0 = arith.constant 0 : i32
    %c0_i32_1 = arith.constant 0 : i32
    return %c0_i32, %c0_i32_0 : i32, i32
  }
  func.func @transform_3(%arg0: i32) -> (i32, i32) {
    %c0_i32 = arith.constant 0 : i32
    %c0_i32_0 = arith.constant 0 : i32
    %c0_i32_1 = arith.constant 0 : i32
    return %c0_i32, %c0_i32_0 : i32, i32
  }
  func.func @transform_4(%arg0: i32) -> (i32, i32) {
    %c0_i32 = arith.constant 0 : i32
    %c0_i32_0 = arith.constant 0 : i32
    %c0_i32_1 = arith.constant 0 : i32
    return %c0_i32, %c0_i32_0 : i32, i32
  }
  func.func @transform_5(%arg0: i32) -> (i32, i32) {
    %c0_i32 = arith.constant 0 : i32
    %c0_i32_0 = arith.constant 0 : i32
    return %arg0, %c0_i32 : i32, i32
  }
}

module attributes {stable_mosaic.version = 11 : i64} {
  func.func @_chain_kernel(%arg0: i32, %arg1: memref<16x128xf32, #tpu.memory_space<vmem>>, %arg2: memref<128x128xf32, #tpu.memory_space<vmem>>, %arg3: memref<1x128xf32, #tpu.memory_space<vmem>>, %arg4: memref<128x128xf32, #tpu.memory_space<vmem>>, %arg5: memref<1x128xf32, #tpu.memory_space<vmem>>, %arg6: memref<128x128xf32, #tpu.memory_space<vmem>>, %arg7: memref<1x128xf32, #tpu.memory_space<vmem>>, %arg8: memref<16x128xf32, #tpu.memory_space<vmem>>) attributes {dimension_semantics = [#tpu.dimension_semantics<parallel>], iteration_bounds = array<i64: 1>, scalar_prefetch = 0 : i64, scratch_operands = 0 : i64, tpu.core_type = #tpu.core_type<tc>, window_params = [{transform_indices = @transform_0, window_bounds = array<i64: 16, 128>}, {pipeline_mode = #tpu.pipeline_mode<synchronous>, transform_indices = @transform_1, window_bounds = array<i64: 128, 128>}, {pipeline_mode = #tpu.pipeline_mode<synchronous>, transform_indices = @transform_2, window_bounds = array<i64: 1, 128>}, {pipeline_mode = #tpu.pipeline_mode<synchronous>, transform_indices = @transform_3, window_bounds = array<i64: 128, 128>}, {pipeline_mode = #tpu.pipeline_mode<synchronous>, transform_indices = @transform_4, window_bounds = array<i64: 1, 128>}, {pipeline_mode = #tpu.pipeline_mode<synchronous>, transform_indices = @transform_5, window_bounds = array<i64: 128, 128>}, {pipeline_mode = #tpu.pipeline_mode<synchronous>, transform_indices = @transform_6, window_bounds = array<i64: 1, 128>}, {transform_indices = @transform_7, window_bounds = array<i64: 16, 128>}]} {
    %c0 = arith.constant 0 : index
    %c0_0 = arith.constant 0 : index
    %0 = vector.load %arg1[%c0, %c0_0] : memref<16x128xf32, #tpu.memory_space<vmem>>, vector<16x128xf32>
    %1 = arith.truncf %0 : vector<16x128xf32> to vector<16x128xbf16>
    %c0_1 = arith.constant 0 : index
    %c0_2 = arith.constant 0 : index
    %2 = vector.load %arg2[%c0_1, %c0_2] : memref<128x128xf32, #tpu.memory_space<vmem>>, vector<128x128xf32>
    %3 = arith.truncf %2 : vector<128x128xf32> to vector<128x128xbf16>
    %c0_3 = arith.constant 0 : index
    %c0_4 = arith.constant 0 : index
    %4 = vector.load %arg3[%c0_3, %c0_4] : memref<1x128xf32, #tpu.memory_space<vmem>>, vector<1x128xf32>
    %cst = arith.constant dense<0.000000e+00> : vector<16x128xf32>
    %5 = tpu.matmul %1, %3, %cst {dimension_numbers = #tpu.dot_dimension_numbers<[1], [0], [0], [1], [0, 0, 1, 1], [], []>} : vector<16x128xbf16>, vector<128x128xbf16>, vector<16x128xf32> -> vector<16x128xf32>
    %6 = vector.broadcast %4 : vector<1x128xf32> to vector<16x128xf32>
    %7 = arith.addf %5, %6 : vector<16x128xf32>
    %cst_5 = arith.constant 0.000000e+00 : f32
    %8 = vector.broadcast %cst_5 : f32 to vector<16x128xf32>
    %9 = arith.cmpf oge, %7, %8 : vector<16x128xf32>
    %cst_6 = arith.constant 2.500000e-01 : f32
    %10 = vector.broadcast %cst_6 : f32 to vector<16x128xf32>
    %11 = arith.mulf %10, %7 : vector<16x128xf32>
    %12 = arith.select %9, %7, %11 : vector<16x128xi1>, vector<16x128xf32>
    %13 = arith.truncf %12 : vector<16x128xf32> to vector<16x128xbf16>
    %c0_7 = arith.constant 0 : index
    %c0_8 = arith.constant 0 : index
    %14 = vector.load %arg4[%c0_7, %c0_8] : memref<128x128xf32, #tpu.memory_space<vmem>>, vector<128x128xf32>
    %15 = arith.truncf %14 : vector<128x128xf32> to vector<128x128xbf16>
    %c0_9 = arith.constant 0 : index
    %c0_10 = arith.constant 0 : index
    %16 = vector.load %arg5[%c0_9, %c0_10] : memref<1x128xf32, #tpu.memory_space<vmem>>, vector<1x128xf32>
    %cst_11 = arith.constant dense<0.000000e+00> : vector<16x128xf32>
    %17 = tpu.matmul %13, %15, %cst_11 {dimension_numbers = #tpu.dot_dimension_numbers<[1], [0], [0], [1], [0, 0, 1, 1], [], []>} : vector<16x128xbf16>, vector<128x128xbf16>, vector<16x128xf32> -> vector<16x128xf32>
    %18 = vector.broadcast %16 : vector<1x128xf32> to vector<16x128xf32>
    %19 = arith.addf %17, %18 : vector<16x128xf32>
    %cst_12 = arith.constant 0.000000e+00 : f32
    %20 = vector.broadcast %cst_12 : f32 to vector<16x128xf32>
    %21 = arith.cmpf oge, %19, %20 : vector<16x128xf32>
    %cst_13 = arith.constant 2.500000e-01 : f32
    %22 = vector.broadcast %cst_13 : f32 to vector<16x128xf32>
    %23 = arith.mulf %22, %19 : vector<16x128xf32>
    %24 = arith.select %21, %19, %23 : vector<16x128xi1>, vector<16x128xf32>
    %25 = arith.truncf %24 : vector<16x128xf32> to vector<16x128xbf16>
    %c0_14 = arith.constant 0 : index
    %c0_15 = arith.constant 0 : index
    %26 = vector.load %arg6[%c0_14, %c0_15] : memref<128x128xf32, #tpu.memory_space<vmem>>, vector<128x128xf32>
    %27 = arith.truncf %26 : vector<128x128xf32> to vector<128x128xbf16>
    %c0_16 = arith.constant 0 : index
    %c0_17 = arith.constant 0 : index
    %28 = vector.load %arg7[%c0_16, %c0_17] : memref<1x128xf32, #tpu.memory_space<vmem>>, vector<1x128xf32>
    %cst_18 = arith.constant dense<0.000000e+00> : vector<16x128xf32>
    %29 = tpu.matmul %25, %27, %cst_18 {dimension_numbers = #tpu.dot_dimension_numbers<[1], [0], [0], [1], [0, 0, 1, 1], [], []>} : vector<16x128xbf16>, vector<128x128xbf16>, vector<16x128xf32> -> vector<16x128xf32>
    %30 = vector.broadcast %28 : vector<1x128xf32> to vector<16x128xf32>
    %31 = arith.addf %29, %30 : vector<16x128xf32>
    %c0_19 = arith.constant 0 : index
    %c0_20 = arith.constant 0 : index
    %32 = vector.load %arg8[%c0_19, %c0_20] : memref<16x128xf32, #tpu.memory_space<vmem>>, vector<16x128xf32>
    tpu.vector_store %arg8[%c0_19, %c0_20], %31 {strides = array<i32>} : memref<16x128xf32, #tpu.memory_space<vmem>>, vector<16x128xf32>,
    return
  }
  func.func @transform_0(%arg0: i32) -> (i32, i32) {
    %c0_i32 = arith.constant 0 : i32
    %c0_i32_0 = arith.constant 0 : i32
    return %arg0, %c0_i32 : i32, i32
  }
  func.func @transform_1(%arg0: i32) -> (i32, i32) {
    %c0_i32 = arith.constant 0 : i32
    %c0_i32_0 = arith.constant 0 : i32
    %c0_i32_1 = arith.constant 0 : i32
    return %c0_i32, %c0_i32_0 : i32, i32
  }
  func.func @transform_2(%arg0: i32) -> (i32, i32) {
    %c0_i32 = arith.constant 0 : i32
    %c0_i32_0 = arith.constant 0 : i32
    %c0_i32_1 = arith.constant 0 : i32
    return %c0_i32, %c0_i32_0 : i32, i32
  }
  func.func @transform_3(%arg0: i32) -> (i32, i32) {
    %c0_i32 = arith.constant 0 : i32
    %c0_i32_0 = arith.constant 0 : i32
    %c0_i32_1 = arith.constant 0 : i32
    return %c0_i32, %c0_i32_0 : i32, i32
  }
  func.func @transform_4(%arg0: i32) -> (i32, i32) {
    %c0_i32 = arith.constant 0 : i32
    %c0_i32_0 = arith.constant 0 : i32
    %c0_i32_1 = arith.constant 0 : i32
    return %c0_i32, %c0_i32_0 : i32, i32
  }
  func.func @transform_5(%arg0: i32) -> (i32, i32) {
    %c0_i32 = arith.constant 0 : i32
    %c0_i32_0 = arith.constant 0 : i32
    %c0_i32_1 = arith.constant 0 : i32
    return %c0_i32, %c0_i32_0 : i32, i32
  }
  func.func @transform_6(%arg0: i32) -> (i32, i32) {
    %c0_i32 = arith.constant 0 : i32
    %c0_i32_0 = arith.constant 0 : i32
    %c0_i32_1 = arith.constant 0 : i32
    return %c0_i32, %c0_i32_0 : i32, i32
  }
  func.func @transform_7(%arg0: i32) -> (i32, i32) {
    %c0_i32 = arith.constant 0 : i32
    %c0_i32_0 = arith.constant 0 : i32
    return %arg0, %c0_i32 : i32, i32
  }
}

</mosaic_0001>

<bundles_post_ra>
// kernel: hgmae_forward.30
= control target key start
LH: loop header
LB: loop body
LE: loop exit
PB: predicated region body
PF: predicated region fallthrough
CT: control target
= control target key end

     0   :  { %v150_v0 = vmov 0.0   ;;  %vm151_vm0 = vmmov 0   ;;  %s235_s1 = inlined_call_operand.vmem [shape: f32[128,128], index: 1, kind: input, shape index: {}]   ;;  %s236_s0 = inlined_call_operand.vmem [shape: f32[16,128], index: 0, kind: input, shape index: {}]   ;;  %s237_s2 = inlined_call_operand.vmem [shape: f32[1,128], index: 2, kind: input, shape index: {}]   ;;  %s238_s3 = inlined_call_operand.vmem [shape: f32[16,128], index: 3, kind: output, shape index: {}]  }
   0x1   :  { %124 = vmatprep.subr.bf16.mxu0 %v150_v0  ;;  %v32_v1 = vld [vmem:[%s235_s1 + $0x70] sm:$0xff]  ;;  %v33_v2 = vld [vmem:[%s235_s1 + $0x78] sm:$0xff]  ;;  %v30_v3 = vld [vmem:[%s235_s1 + $0x60] sm:$0xff]  ;;  %140 = vmatprep.mubr.msk.bf16.mxu0 %vm151_vm0, %v150_v0 }
   0x2   :  { %v41_v4 = vpack.c.bf16 %v33_v2, %v32_v1  ;;  %v31_v5 = vld [vmem:[%s235_s1 + $0x68] sm:$0xff]  ;;  %v28_v7 = vld [vmem:[%s235_s1 + $0x50] sm:$0xff]  ;;  %v29_v8 = vld [vmem:[%s235_s1 + $0x58] sm:$0xff] }
   0x3   :  { %v40_v6 = vpack.c.bf16 %v31_v5, %v30_v3  ;;  %v39_v9 = vpack.c.bf16 %v29_v8, %v28_v7  ;;  %v26_v10 = vld [vmem:[%s235_s1 + $0x40] sm:$0xff]  ;;  %v27_v11 = vld [vmem:[%s235_s1 + $0x48] sm:$0xff]  ;;  %v24_v13 = vld [vmem:[%s235_s1 + $0x30] sm:$0xff] }
   0x4   :  { %125 = vmatpush3.bf16.msra.mxu0 %v41_v4  ;;  %v38_v12 = vpack.c.bf16 %v27_v11, %v26_v10  ;;  %v25_v14 = vld [vmem:[%s235_s1 + $0x38] sm:$0xff]  ;;  %v22_v16 = vld [vmem:[%s235_s1 + $0x20] sm:$0xff]  ;;  %v23_v17 = vld [vmem:[%s235_s1 + $0x28] sm:$0xff] }
   0x5   :  { %126 = vmatprep.subr.bf16.mxu0 %v150_v0  ;;  %v37_v15 = vpack.c.bf16 %v25_v14, %v24_v13  ;;  %v36_v18 = vpack.c.bf16 %v23_v17, %v22_v16  ;;  %v20_v19 = vld [vmem:[%s235_s1 + $0x10] sm:$0xff]  ;;  %v21_v20 = vld [vmem:[%s235_s1 + $0x18] sm:$0xff]  ;;  %v18_v22 = vld [vmem:[%s235_s1] sm:$0xff] }
   0x6   :  { %v35_v21 = vpack.c.bf16 %v21_v20, %v20_v19  ;;  %v19_v23 = vld [vmem:[%s235_s1 + $0x8] sm:$0xff]  ;;  %v15_v25 = vld [vmem:[%s236_s0] sm:$0xff] }
   0x7   :  { %v34_v24 = vpack.c.bf16 %v19_v23, %v18_v22  ;;  %v16_v26 = vld [vmem:[%s236_s0 + $0x8] sm:$0xff]  ;;  %v114_v28 = vld [vmem:[%s237_s2] ss:$0 sm:$0xff] }
   0x8   :  { %127 = vmatpush3.bf16.msra.mxu0 %v40_v6  ;;  %v17_v27 = vpack.c.bf16 %v16_v26, %v15_v25 }
   0x9   :  { %128 = vmatprep.subr.bf16.mxu0 %v150_v0 }
   0xc   :  { %129 = vmatpush3.bf16.msra.mxu0 %v39_v9 }
   0xd   :  { %130 = vmatprep.subr.bf16.mxu0 %v150_v0 }
  0x10   :  { %131 = vmatpush3.bf16.msra.mxu0 %v38_v12 }
  0x11   :  { %132 = vmatprep.subr.bf16.mxu0 %v150_v0 }
  0x14   :  { %133 = vmatpush3.bf16.msra.mxu0 %v37_v15 }
  0x15   :  { %134 = vmatprep.subr.bf16.mxu0 %v150_v0 }
  0x18   :  { %135 = vmatpush3.bf16.msra.mxu0 %v36_v18 }
  0x19   :  { %136 = vmatprep.subr.bf16.mxu0 %v150_v0 }
  0x1c   :  { %137 = vmatpush3.bf16.msra.mxu0 %v35_v21 }
  0x1d   :  { %138 = vmatprep.subr.bf16.mxu0 %v150_v0 }
  0x20   :  { %139 = vmatpush3.bf16.msra.mxu0 %v34_v24 }
  0x23   :  { %141 = vmatmul.mubr.bf16.vlgmr.msra.gmra.mxu0 %v17_v27 }
  0xe3   :  { %v83_v29 = vpop.f32.mrf.mxu0 }
  0xe4   :  { %v84_v30 = vadd.f32 %v114_v28, %v83_v29 }
  0xe5   :  { %v142_v31 = vpop.f32.mrf.mxu0 }
  0xe6   :  { %v90_v32 = vmul.f32 %v84_v30, %v84_v30 }
  0xe7   :  { %v86_v33 = vpop.f32.mrf.mxu0 }
  0xe8   :  { %v92_v34 = vmul.f32 %v90_v32, %v84_v30  ;;  %v87_v35 = vadd.f32 %v114_v28, %v86_v33 }
  0xe9   :  { %v143_v36 = vpop.f32.mrf.mxu0 }
  0xea   :  { %v94_v37 = vmul.f32 0.044715, %v92_v34  ;;  %v91_v38 = vmul.f32 %v87_v35, %v87_v35 }
  0xec   :  { %v96_v39 = vadd.f32 %v94_v37, %v84_v30  ;;  %v93_v40 = vmul.f32 %v91_v38, %v87_v35 }
  0xee   :  { %v98_v41 = vmul.f32 0.7978846, %v96_v39  ;;  %v95_v42 = vmul.f32 0.044715, %v93_v40 }
  0xf0   :  { %146 = vtanh.f32 %v98_v41  ;;  %v97_v43 = vadd.f32 %v95_v42, %v87_v35 }
  0xf2   :  { %v99_v44 = vmul.f32 0.7978846, %v97_v43 }
  0xf4   :  { %148 = vtanh.f32 %v99_v44 }
  0xfd   :  { %v147_v45 = vpop.eup %146 }
  0xfe   :  { %v102_v46 = vadd.f32 1.0, %v147_v45 }
 0x100   :  { %v104_v47 = vmul.f32 0.5, %v102_v46 }
 0x101   :  { %v149_v48 = vpop.eup %148 }
 0x102   :  { %v106_v49 = vmul.f32 %v104_v47, %v84_v30  ;;  %v103_v50 = vadd.f32 1.0, %v149_v48 }
 0x104   :  { %108 = vst [vmem:[%s238_s3] sm:$0xff] %v106_v49  ;;  %v105_v51 = vmul.f32 0.5, %v103_v50 }
 0x106   :  { %v107_v52 = vmul.f32 %v105_v51, %v87_v35 }
 0x108   :  { %109 = vst [vmem:[%s238_s3 + $0x8] sm:$0xff] %v107_v52 }

// kernel: hgmae_forward.23
= control target key start
LH: loop header
LB: loop body
LE: loop exit
PB: predicated region body
PF: predicated region fallthrough
CT: control target
= control target key end

     0   :  { %v237_v0 = vmov 0.0   ;;  %vm238_vm0 = vmmov 0   ;;  %s401_s1 = inlined_call_operand.vmem [shape: f32[128,128], index: 1, kind: input, shape index: {}]   ;;  %s402_s3 = inlined_call_operand.vmem [shape: f32[128,128], index: 3, kind: input, shape index: {}]   ;;  %s403_s0 = inlined_call_operand.vmem [shape: f32[16,128], index: 0, kind: input, shape index: {}]   ;;  %s404_s2 = inlined_call_operand.vmem [shape: f32[1,128], index: 2, kind: input, shape index: {}]   ;;  %s405_s4 = inlined_call_operand.vmem [shape: f32[1,128], index: 4, kind: input, shape index: {}]   ;;  %s406_s5 = inlined_call_operand.vmem [shape: f32[16,128], index: 5, kind: output, shape index: {}]  }
   0x1   :  { %195 = vmatprep.subr.bf16.mxu0 %v237_v0  ;;  %v38_v1 = vld [vmem:[%s401_s1 + $0x70] sm:$0xff]  ;;  %v39_v2 = vld [vmem:[%s401_s1 + $0x78] sm:$0xff]  ;;  %v36_v3 = vld [vmem:[%s401_s1 + $0x60] sm:$0xff]  ;;  %211 = vmatprep.mubr.msk.bf16.mxu0 %vm238_vm0, %v237_v0 }
   0x2   :  { %v47_v4 = vpack.c.bf16 %v39_v2, %v38_v1  ;;  %v37_v5 = vld [vmem:[%s401_s1 + $0x68] sm:$0xff]  ;;  %215 = vmatprep.subr.bf16.mxu1 %v237_v0  ;;  %231 = vmatprep.mubr.msk.bf16.mxu1 %vm238_vm0, %v237_v0  ;;  %v34_v7 = vld [vmem:[%s401_s1 + $0x50] sm:$0xff]  ;;  %v35_v8 = vld [vmem:[%s401_s1 + $0x58] sm:$0xff] }
   0x3   :  { %v46_v6 = vpack.c.bf16 %v37_v5, %v36_v3  ;;  %v111_v9 = vld [vmem:[%s402_s3 + $0x70] sm:$0xff]  ;;  %v112_v10 = vld [vmem:[%s402_s3 + $0x78] sm:$0xff]  ;;  %v109_v11 = vld [vmem:[%s402_s3 + $0x60] sm:$0xff]  ;;  %v45_v12 = vpack.c.bf16 %v35_v8, %v34_v7 }
   0x4   :  { %196 = vmatpush3.bf16.msra.mxu0 %v47_v4  ;;  %v120_v13 = vpack.c.bf16 %v112_v10, %v111_v9  ;;  %v110_v14 = vld [vmem:[%s402_s3 + $0x68] sm:$0xff]  ;;  %v32_v15 = vld [vmem:[%s401_s1 + $0x40] sm:$0xff]  ;;  %v107_v18 = vld [vmem:[%s402_s3 + $0x50] sm:$0xff] }
   0x5   :  { %197 = vmatprep.subr.bf16.mxu0 %v237_v0  ;;  %v33_v16 = vld [vmem:[%s401_s1 + $0x48] sm:$0xff]  ;;  %v119_v17 = vpack.c.bf16 %v110_v14, %v109_v11  ;;  %v108_v19 = vld [vmem:[%s402_s3 + $0x58] sm:$0xff]  ;;  %v30_v21 = vld [vmem:[%s401_s1 + $0x30] sm:$0xff] }
   0x6   :  { %216 = vmatpush3.bf16.msra.mxu1 %v120_v13  ;;  %v44_v20 = vpack.c.bf16 %v33_v16, %v32_v15  ;;  %v31_v22 = vld [vmem:[%s401_s1 + $0x38] sm:$0xff]  ;;  %v118_v23 = vpack.c.bf16 %v108_v19, %v107_v18  ;;  %v105_v24 = vld [vmem:[%s402_s3 + $0x40] sm:$0xff]  ;;  %v106_v25 = vld [vmem:[%s402_s3 + $0x48] sm:$0xff] }
   0x7   :  { %217 = vmatprep.subr.bf16.mxu1 %v237_v0  ;;  %v43_v26 = vpack.c.bf16 %v31_v22, %v30_v21  ;;  %v28_v27 = vld [vmem:[%s401_s1 + $0x20] sm:$0xff]  ;;  %v29_v28 = vld [vmem:[%s401_s1 + $0x28] sm:$0xff]  ;;  %v117_v29 = vpack.c.bf16 %v106_v25, %v105_v24  ;;  %v103_v30 = vld [vmem:[%s402_s3 + $0x30] sm:$0xff] }
   0x8   :  { %198 = vmatpush3.bf16.msra.mxu0 %v46_v6  ;;  %v104_v31 = vld [vmem:[%s402_s3 + $0x38] sm:$0xff]  ;;  %v42_v32 = vpack.c.bf16 %v29_v28, %v28_v27  ;;  %v26_v33 = vld [vmem:[%s401_s1 + $0x10] sm:$0xff]  ;;  %v101_v36 = vld [vmem:[%s402_s3 + $0x20] sm:$0xff] }
   0x9   :  { %199 = vmatprep.subr.bf16.mxu0 %v237_v0  ;;  %v27_v34 = vld [vmem:[%s401_s1 + $0x18] sm:$0xff]  ;;  %v116_v35 = vpack.c.bf16 %v104_v31, %v103_v30  ;;  %v102_v37 = vld [vmem:[%s402_s3 + $0x28] sm:$0xff]  ;;  %v24_v39 = vld [vmem:[%s401_s1] sm:$0xff] }
   0xa   :  { %218 = vmatpush3.bf16.msra.mxu1 %v119_v17  ;;  %v41_v38 = vpack.c.bf16 %v27_v34, %v26_v33  ;;  %v25_v40 = vld [vmem:[%s401_s1 + $0x8] sm:$0xff]  ;;  %v115_v41 = vpack.c.bf16 %v102_v37, %v101_v36  ;;  %v21_v43 = vld [vmem:[%s403_s0] sm:$0xff]  ;;  %v99_v46 = vld [vmem:[%s402_s3 + $0x10] sm:$0xff] }
   0xb   :  { %219 = vmatprep.subr.bf16.mxu1 %v237_v0  ;;  %v40_v42 = vpack.c.bf16 %v25_v40, %v24_v39  ;;  %v22_v44 = vld [vmem:[%s403_s0 + $0x8] sm:$0xff]  ;;  %v100_v47 = vld [vmem:[%s402_s3 + $0x18] sm:$0xff]  ;;  %v97_v49 = vld [vmem:[%s402_s3] sm:$0xff] }
   0xc   :  { %200 = vmatpush3.bf16.msra.mxu0 %v45_v12  ;;  %v23_v45 = vpack.c.bf16 %v22_v44, %v21_v43  ;;  %v114_v48 = vpack.c.bf16 %v100_v47, %v99_v46  ;;  %v98_v50 = vld [vmem:[%s402_s3 + $0x8] sm:$0xff]  ;;  %v175_v53 = vld [vmem:[%s404_s2] ss:$0 sm:$0xff] }
   0xd   :  { %201 = vmatprep.subr.bf16.mxu0 %v237_v0  ;;  %v113_v51 = vpack.c.bf16 %v98_v50, %v97_v49  ;;  %v176_v60 = vld [vmem:[%s405_s4] ss:$0 sm:$0xff] }
   0xe   :  { %220 = vmatpush3.bf16.msra.mxu1 %v118_v23 }
   0xf   :  { %221 = vmatprep.subr.bf16.mxu1 %v237_v0 }
  0x10   :  { %202 = vmatpush3.bf16.msra.mxu0 %v44_v20 }
  0x11   :  { %203 = vmatprep.subr.bf16.mxu0 %v237_v0 }
  0x12   :  { %222 = vmatpush3.bf16.msra.mxu1 %v117_v29 }
  0x13   :  { %223 = vmatprep.subr.bf16.mxu1 %v237_v0 }
  0x14   :  { %204 = vmatpush3.bf16.msra.mxu0 %v43_v26 }
  0x15   :  { %205 = vmatprep.subr.bf16.mxu0 %v237_v0 }
  0x16   :  { %224 = vmatpush3.bf16.msra.mxu1 %v116_v35 }
  0x17   :  { %225 = vmatprep.subr.bf16.mxu1 %v237_v0 }
  0x18   :  { %206 = vmatpush3.bf16.msra.mxu0 %v42_v32 }
  0x19   :  { %207 = vmatprep.subr.bf16.mxu0 %v237_v0 }
  0x1a   :  { %226 = vmatpush3.bf16.msra.mxu1 %v115_v41 }
  0x1b   :  { %227 = vmatprep.subr.bf16.mxu1 %v237_v0 }
  0x1c   :  { %208 = vmatpush3.bf16.msra.mxu0 %v41_v38 }
  0x1d   :  { %209 = vmatprep.subr.bf16.mxu0 %v237_v0 }
  0x1e   :  { %228 = vmatpush3.bf16.msra.mxu1 %v114_v48 }
  0x1f   :  { %229 = vmatprep.subr.bf16.mxu1 %v237_v0 }
  0x20   :  { %210 = vmatpush3.bf16.msra.mxu0 %v40_v42 }
  0x22   :  { %230 = vmatpush3.bf16.msra.mxu1 %v113_v51 }
  0x23   :  { %212 = vmatmul.mubr.bf16.vlgmr.msra.gmra.mxu0 %v23_v45 }
  0xe3   :  { %v89_v52 = vpop.f32.mrf.mxu0 }
  0xe4   :  { %v90_v56 = vadd.f32 %v175_v53, %v89_v52 }
  0xe5   :  { %v213_v54 = vpop.f32.mrf.mxu0 }
  0xe7   :  { %v92_v55 = vpop.f32.mrf.mxu0 }
  0xe8   :  { %v93_v57 = vadd.f32 %v175_v53, %v92_v55 }
  0xe9   :  { %v214_v58 = vpop.f32.mrf.mxu0 }
  0xea   :  { %v96_v59 = vpack.c.bf16 %v93_v57, %v90_v56 }
  0xec   :  { %232 = vmatmul.mubr.bf16.vlgmr.msra.gmra.mxu1 %v96_v59 }
 0x1ac   :  { %v162_v61 = vpop.f32.mrf.mxu1 }
 0x1ad   :  { %v163_v62 = vadd.f32 %v176_v60, %v162_v61 }
 0x1ae   :  { %v233_v63 = vpop.f32.mrf.mxu1 }
 0x1af   :  { %169 = vst [vmem:[%s406_s5] sm:$0xff] %v163_v62 }
 0x1b0   :  { %v165_v0 = vpop.f32.mrf.mxu1 }
 0x1b1   :  { %v166_v1 = vadd.f32 %v176_v60, %v165_v0 }
 0x1b2   :  { %v234_v2 = vpop.f32.mrf.mxu1 }
 0x1b3   :  { %170 = vst [vmem:[%s406_s5 + $0x8] sm:$0xff] %v166_v1 }

// kernel: hgmae_forward.24
= control target key start
LH: loop header
LB: loop body
LE: loop exit
PB: predicated region body
PF: predicated region fallthrough
CT: control target
= control target key end

     0   :  { %v259_v0 = vmov 0.0   ;;  %vm260_vm0 = vmmov 0   ;;  %s423_s1 = inlined_call_operand.vmem [shape: f32[128,128], index: 1, kind: input, shape index: {}]   ;;  %s424_s3 = inlined_call_operand.vmem [shape: f32[128,128], index: 3, kind: input, shape index: {}]   ;;  %s425_s0 = inlined_call_operand.vmem [shape: f32[16,128], index: 0, kind: input, shape index: {}]   ;;  %s426_s2 = inlined_call_operand.vmem [shape: f32[1,128], index: 2, kind: input, shape index: {}]   ;;  %s427_s4 = inlined_call_operand.vmem [shape: f32[1,128], index: 4, kind: input, shape index: {}]   ;;  %s428_s5 = inlined_call_operand.vmem [shape: f32[16,128], index: 5, kind: output, shape index: {}]  }
   0x1   :  { %213 = vmatprep.subr.bf16.mxu0 %v259_v0  ;;  %v38_v1 = vld [vmem:[%s423_s1 + $0x70] sm:$0xff]  ;;  %v39_v2 = vld [vmem:[%s423_s1 + $0x78] sm:$0xff]  ;;  %v36_v3 = vld [vmem:[%s423_s1 + $0x60] sm:$0xff]  ;;  %229 = vmatprep.mubr.msk.bf16.mxu0 %vm260_vm0, %v259_v0 }
   0x2   :  { %v47_v4 = vpack.c.bf16 %v39_v2, %v38_v1  ;;  %v37_v5 = vld [vmem:[%s423_s1 + $0x68] sm:$0xff]  ;;  %233 = vmatprep.subr.bf16.mxu1 %v259_v0  ;;  %249 = vmatprep.mubr.msk.bf16.mxu1 %vm260_vm0, %v259_v0  ;;  %v34_v7 = vld [vmem:[%s423_s1 + $0x50] sm:$0xff]  ;;  %v35_v8 = vld [vmem:[%s423_s1 + $0x58] sm:$0xff] }
   0x3   :  { %v46_v6 = vpack.c.bf16 %v37_v5, %v36_v3  ;;  %v111_v9 = vld [vmem:[%s424_s3 + $0x70] sm:$0xff]  ;;  %v112_v10 = vld [vmem:[%s424_s3 + $0x78] sm:$0xff]  ;;  %v109_v11 = vld [vmem:[%s424_s3 + $0x60] sm:$0xff]  ;;  %v45_v12 = vpack.c.bf16 %v35_v8, %v34_v7 }
   0x4   :  { %214 = vmatpush3.bf16.msra.mxu0 %v47_v4  ;;  %v120_v13 = vpack.c.bf16 %v112_v10, %v111_v9  ;;  %v110_v14 = vld [vmem:[%s424_s3 + $0x68] sm:$0xff]  ;;  %v32_v15 = vld [vmem:[%s423_s1 + $0x40] sm:$0xff]  ;;  %v107_v18 = vld [vmem:[%s424_s3 + $0x50] sm:$0xff] }
   0x5   :  { %215 = vmatprep.subr.bf16.mxu0 %v259_v0  ;;  %v33_v16 = vld [vmem:[%s423_s1 + $0x48] sm:$0xff]  ;;  %v119_v17 = vpack.c.bf16 %v110_v14, %v109_v11  ;;  %v108_v19 = vld [vmem:[%s424_s3 + $0x58] sm:$0xff]  ;;  %v30_v21 = vld [vmem:[%s423_s1 + $0x30] sm:$0xff] }
   0x6   :  { %234 = vmatpush3.bf16.msra.mxu1 %v120_v13  ;;  %v44_v20 = vpack.c.bf16 %v33_v16, %v32_v15  ;;  %v31_v22 = vld [vmem:[%s423_s1 + $0x38] sm:$0xff]  ;;  %v118_v23 = vpack.c.bf16 %v108_v19, %v107_v18  ;;  %v105_v24 = vld [vmem:[%s424_s3 + $0x40] sm:$0xff]  ;;  %v106_v25 = vld [vmem:[%s424_s3 + $0x48] sm:$0xff] }
   0x7   :  { %235 = vmatprep.subr.bf16.mxu1 %v259_v0  ;;  %v43_v26 = vpack.c.bf16 %v31_v22, %v30_v21  ;;  %v28_v27 = vld [vmem:[%s423_s1 + $0x20] sm:$0xff]  ;;  %v29_v28 = vld [vmem:[%s423_s1 + $0x28] sm:$0xff]  ;;  %v117_v29 = vpack.c.bf16 %v106_v25, %v105_v24  ;;  %v103_v30 = vld [vmem:[%s424_s3 + $0x30] sm:$0xff] }
   0x8   :  { %216 = vmatpush3.bf16.msra.mxu0 %v46_v6  ;;  %v104_v31 = vld [vmem:[%s424_s3 + $0x38] sm:$0xff]  ;;  %v42_v32 = vpack.c.bf16 %v29_v28, %v28_v27  ;;  %v26_v33 = vld [vmem:[%s423_s1 + $0x10] sm:$0xff]  ;;  %v101_v36 = vld [vmem:[%s424_s3 + $0x20] sm:$0xff] }
   0x9   :  { %217 = vmatprep.subr.bf16.mxu0 %v259_v0  ;;  %v27_v34 = vld [vmem:[%s423_s1 + $0x18] sm:$0xff]  ;;  %v116_v35 = vpack.c.bf16 %v104_v31, %v103_v30  ;;  %v102_v37 = vld [vmem:[%s424_s3 + $0x28] sm:$0xff]  ;;  %v24_v39 = vld [vmem:[%s423_s1] sm:$0xff] }
   0xa   :  { %236 = vmatpush3.bf16.msra.mxu1 %v119_v17  ;;  %v41_v38 = vpack.c.bf16 %v27_v34, %v26_v33  ;;  %v25_v40 = vld [vmem:[%s423_s1 + $0x8] sm:$0xff]  ;;  %v115_v41 = vpack.c.bf16 %v102_v37, %v101_v36  ;;  %v21_v43 = vld [vmem:[%s425_s0] sm:$0xff]  ;;  %v99_v46 = vld [vmem:[%s424_s3 + $0x10] sm:$0xff] }
   0xb   :  { %237 = vmatprep.subr.bf16.mxu1 %v259_v0  ;;  %v40_v42 = vpack.c.bf16 %v25_v40, %v24_v39  ;;  %v22_v44 = vld [vmem:[%s425_s0 + $0x8] sm:$0xff]  ;;  %v100_v47 = vld [vmem:[%s424_s3 + $0x18] sm:$0xff]  ;;  %v97_v49 = vld [vmem:[%s424_s3] sm:$0xff] }
   0xc   :  { %218 = vmatpush3.bf16.msra.mxu0 %v45_v12  ;;  %v23_v45 = vpack.c.bf16 %v22_v44, %v21_v43  ;;  %v114_v48 = vpack.c.bf16 %v100_v47, %v99_v46  ;;  %v98_v50 = vld [vmem:[%s424_s3 + $0x8] sm:$0xff]  ;;  %v193_v53 = vld [vmem:[%s426_s2] ss:$0 sm:$0xff] }
   0xd   :  { %219 = vmatprep.subr.bf16.mxu0 %v259_v0  ;;  %v113_v51 = vpack.c.bf16 %v98_v50, %v97_v49  ;;  %v194_v60 = vld [vmem:[%s427_s4] ss:$0 sm:$0xff] }
   0xe   :  { %238 = vmatpush3.bf16.msra.mxu1 %v118_v23 }
   0xf   :  { %239 = vmatprep.subr.bf16.mxu1 %v259_v0 }
  0x10   :  { %220 = vmatpush3.bf16.msra.mxu0 %v44_v20 }
  0x11   :  { %221 = vmatprep.subr.bf16.mxu0 %v259_v0 }
  0x12   :  { %240 = vmatpush3.bf16.msra.mxu1 %v117_v29 }
  0x13   :  { %241 = vmatprep.subr.bf16.mxu1 %v259_v0 }
  0x14   :  { %222 = vmatpush3.bf16.msra.mxu0 %v43_v26 }
  0x15   :  { %223 = vmatprep.subr.bf16.mxu0 %v259_v0 }
  0x16   :  { %242 = vmatpush3.bf16.msra.mxu1 %v116_v35 }
  0x17   :  { %243 = vmatprep.subr.bf16.mxu1 %v259_v0 }
  0x18   :  { %224 = vmatpush3.bf16.msra.mxu0 %v42_v32 }
  0x19   :  { %225 = vmatprep.subr.bf16.mxu0 %v259_v0 }
  0x1a   :  { %244 = vmatpush3.bf16.msra.mxu1 %v115_v41 }
  0x1b   :  { %245 = vmatprep.subr.bf16.mxu1 %v259_v0 }
  0x1c   :  { %226 = vmatpush3.bf16.msra.mxu0 %v41_v38 }
  0x1d   :  { %227 = vmatprep.subr.bf16.mxu0 %v259_v0 }
  0x1e   :  { %246 = vmatpush3.bf16.msra.mxu1 %v114_v48 }
  0x1f   :  { %247 = vmatprep.subr.bf16.mxu1 %v259_v0 }
  0x20   :  { %228 = vmatpush3.bf16.msra.mxu0 %v40_v42 }
  0x22   :  { %248 = vmatpush3.bf16.msra.mxu1 %v113_v51 }
  0x23   :  { %230 = vmatmul.mubr.bf16.vlgmr.msra.gmra.mxu0 %v23_v45 }
  0xe3   :  { %v89_v52 = vpop.f32.mrf.mxu0 }
  0xe4   :  { %v90_v56 = vadd.f32 %v193_v53, %v89_v52 }
  0xe5   :  { %v231_v54 = vpop.f32.mrf.mxu0 }
  0xe7   :  { %v92_v55 = vpop.f32.mrf.mxu0 }
  0xe8   :  { %v93_v57 = vadd.f32 %v193_v53, %v92_v55 }
  0xe9   :  { %v232_v58 = vpop.f32.mrf.mxu0 }
  0xea   :  { %v96_v59 = vpack.c.bf16 %v93_v57, %v90_v56 }
  0xec   :  { %250 = vmatmul.mubr.bf16.vlgmr.msra.gmra.mxu1 %v96_v59 }
 0x1ac   :  { %v162_v61 = vpop.f32.mrf.mxu1 }
 0x1ad   :  { %v163_v62 = vadd.f32 %v194_v60, %v162_v61 }
 0x1ae   :  { %v251_v63 = vpop.f32.mrf.mxu1 }
 0x1af   :  { %v169_v0 = vmul.f32 %v163_v62, %v163_v62 }
 0x1b0   :  { %v165_v1 = vpop.f32.mrf.mxu1 }
 0x1b1   :  { %v171_v2 = vmul.f32 %v169_v0, %v163_v62  ;;  %v166_v3 = vadd.f32 %v194_v60, %v165_v1 }
 0x1b2   :  { %v252_v4 = vpop.f32.mrf.mxu1 }
 0x1b3   :  { %v173_v5 = vmul.f32 0.044715, %v171_v2  ;;  %v170_v6 = vmul.f32 %v166_v3, %v166_v3 }
 0x1b5   :  { %v175_v7 = vadd.f32 %v173_v5, %v163_v62  ;;  %v172_v8 = vmul.f32 %v170_v6, %v166_v3 }
 0x1b7   :  { %v177_v9 = vmul.f32 0.7978846, %v175_v7  ;;  %v174_v10 = vmul.f32 0.044715, %v172_v8 }
 0x1b9   :  { %255 = vtanh.f32 %v177_v9  ;;  %v176_v11 = vadd.f32 %v174_v10, %v166_v3 }
 0x1bb   :  { %v178_v12 = vmul.f32 0.7978846, %v176_v11 }
 0x1bd   :  { %257 = vtanh.f32 %v178_v12 }
 0x1c6   :  { %v256_v13 = vpop.eup %255 }
 0x1c7   :  { %v181_v14 = vadd.f32 1.0, %v256_v13 }
 0x1c9   :  { %v183_v15 = vmul.f32 0.5, %v181_v14 }
 0x1ca   :  { %v258_v16 = vpop.eup %257 }
 0x1cb   :  { %v185_v17 = vmul.f32 %v183_v15, %v163_v62  ;;  %v182_v18 = vadd.f32 1.0, %v258_v16 }
 0x1cd   :  { %187 = vst [vmem:[%s428_s5] sm:$0xff] %v185_v17  ;;  %v184_v19 = vmul.f32 0.5, %v182_v18 }
 0x1cf   :  { %v186_v20 = vmul.f32 %v184_v19, %v166_v3 }
 0x1d1   :  { %188 = vst [vmem:[%s428_s5 + $0x8] sm:$0xff] %v186_v20 }

// kernel: hgmae_forward.27
= control target key start
LH: loop header
LB: loop body
LE: loop exit
PB: predicated region body
PF: predicated region fallthrough
CT: control target
= control target key end

     0   :  { %v346_v0 = vmov 0.0   ;;  %vm347_vm0 = vmmov 0   ;;  %s583_s1 = inlined_call_operand.vmem [shape: f32[128,128], index: 1, kind: input, shape index: {}]   ;;  %s584_s3 = inlined_call_operand.vmem [shape: f32[128,128], index: 3, kind: input, shape index: {}]   ;;  %s585_s0 = inlined_call_operand.vmem [shape: f32[16,128], index: 0, kind: input, shape index: {}]   ;;  %s586_s5 = inlined_call_operand.vmem [shape: f32[128,128], index: 5, kind: input, shape index: {}]   ;;  %s587_s2 = inlined_call_operand.vmem [shape: f32[1,128], index: 2, kind: input, shape index: {}, may-alias: {2,6}]   ;;  %s588_s4 = inlined_call_operand.vmem [shape: f32[1,128], index: 4, kind: input, shape index: {}]   ;;  %s589_s6 = inlined_call_operand.vmem [shape: f32[1,128], index: 6, kind: input, shape index: {}, may-alias: {2,6}]   ;;  %s590_s7 = inlined_call_operand.vmem [shape: f32[16,128], index: 7, kind: output, shape index: {}]  }
   0x1   :  { %284 = vmatprep.subr.bf16.mxu0 %v346_v0  ;;  %v44_v1 = vld [vmem:[%s583_s1 + $0x70] sm:$0xff]  ;;  %v45_v2 = vld [vmem:[%s583_s1 + $0x78] sm:$0xff]  ;;  %v42_v3 = vld [vmem:[%s583_s1 + $0x60] sm:$0xff]  ;;  %300 = vmatprep.mubr.msk.bf16.mxu0 %vm347_vm0, %v346_v0 }
   0x2   :  { %v53_v4 = vpack.c.bf16 %v45_v2, %v44_v1  ;;  %v43_v5 = vld [vmem:[%s583_s1 + $0x68] sm:$0xff]  ;;  %304 = vmatprep.subr.bf16.mxu1 %v346_v0  ;;  %320 = vmatprep.mubr.msk.bf16.mxu1 %vm347_vm0, %v346_v0  ;;  %v40_v7 = vld [vmem:[%s583_s1 + $0x50] sm:$0xff]  ;;  %v41_v8 = vld [vmem:[%s583_s1 + $0x58] sm:$0xff] }
   0x3   :  { %v52_v6 = vpack.c.bf16 %v43_v5, %v42_v3  ;;  %v117_v9 = vld [vmem:[%s584_s3 + $0x70] sm:$0xff]  ;;  %v118_v10 = vld [vmem:[%s584_s3 + $0x78] sm:$0xff]  ;;  %v115_v11 = vld [vmem:[%s584_s3 + $0x60] sm:$0xff]  ;;  %v51_v12 = vpack.c.bf16 %v41_v8, %v40_v7 }
   0x4   :  { %285 = vmatpush3.bf16.msra.mxu0 %v53_v4  ;;  %v126_v13 = vpack.c.bf16 %v118_v10, %v117_v9  ;;  %v116_v14 = vld [vmem:[%s584_s3 + $0x68] sm:$0xff]  ;;  %v38_v15 = vld [vmem:[%s583_s1 + $0x40] sm:$0xff]  ;;  %v113_v18 = vld [vmem:[%s584_s3 + $0x50] sm:$0xff] }
   0x5   :  { %286 = vmatprep.subr.bf16.mxu0 %v346_v0  ;;  %v39_v16 = vld [vmem:[%s583_s1 + $0x48] sm:$0xff]  ;;  %v125_v17 = vpack.c.bf16 %v116_v14, %v115_v11  ;;  %v114_v19 = vld [vmem:[%s584_s3 + $0x58] sm:$0xff]  ;;  %v36_v21 = vld [vmem:[%s583_s1 + $0x30] sm:$0xff] }
   0x6   :  { %305 = vmatpush3.bf16.msra.mxu1 %v126_v13  ;;  %v50_v20 = vpack.c.bf16 %v39_v16, %v38_v15  ;;  %v37_v22 = vld [vmem:[%s583_s1 + $0x38] sm:$0xff]  ;;  %v124_v23 = vpack.c.bf16 %v114_v19, %v113_v18  ;;  %v111_v24 = vld [vmem:[%s584_s3 + $0x40] sm:$0xff]  ;;  %v112_v25 = vld [vmem:[%s584_s3 + $0x48] sm:$0xff] }
   0x7   :  { %306 = vmatprep.subr.bf16.mxu1 %v346_v0  ;;  %v49_v26 = vpack.c.bf16 %v37_v22, %v36_v21  ;;  %v34_v27 = vld [vmem:[%s583_s1 + $0x20] sm:$0xff]  ;;  %v35_v28 = vld [vmem:[%s583_s1 + $0x28] sm:$0xff]  ;;  %v123_v29 = vpack.c.bf16 %v112_v25, %v111_v24  ;;  %v109_v30 = vld [vmem:[%s584_s3 + $0x30] sm:$0xff] }
   0x8   :  { %287 = vmatpush3.bf16.msra.mxu0 %v52_v6  ;;  %v110_v31 = vld [vmem:[%s584_s3 + $0x38] sm:$0xff]  ;;  %v48_v32 = vpack.c.bf16 %v35_v28, %v34_v27  ;;  %v32_v33 = vld [vmem:[%s583_s1 + $0x10] sm:$0xff]  ;;  %v107_v36 = vld [vmem:[%s584_s3 + $0x20] sm:$0xff] }
   0x9   :  { %288 = vmatprep.subr.bf16.mxu0 %v346_v0  ;;  %v33_v34 = vld [vmem:[%s583_s1 + $0x18] sm:$0xff]  ;;  %v122_v35 = vpack.c.bf16 %v110_v31, %v109_v30  ;;  %v108_v37 = vld [vmem:[%s584_s3 + $0x28] sm:$0xff]  ;;  %v30_v39 = vld [vmem:[%s583_s1] sm:$0xff] }
   0xa   :  { %307 = vmatpush3.bf16.msra.mxu1 %v125_v17  ;;  %v47_v38 = vpack.c.bf16 %v33_v34, %v32_v33  ;;  %v31_v40 = vld [vmem:[%s583_s1 + $0x8] sm:$0xff]  ;;  %v121_v41 = vpack.c.bf16 %v108_v37, %v107_v36  ;;  %v27_v43 = vld [vmem:[%s585_s0] sm:$0xff]  ;;  %v105_v46 = vld [vmem:[%s584_s3 + $0x10] sm:$0xff] }
   0xb   :  { %308 = vmatprep.subr.bf16.mxu1 %v346_v0  ;;  %v46_v42 = vpack.c.bf16 %v31_v40, %v30_v39  ;;  %v28_v44 = vld [vmem:[%s585_s0 + $0x8] sm:$0xff]  ;;  %v106_v47 = vld [vmem:[%s584_s3 + $0x18] sm:$0xff]  ;;  %v103_v49 = vld [vmem:[%s584_s3] sm:$0xff] }
   0xc   :  { %289 = vmatpush3.bf16.msra.mxu0 %v51_v12  ;;  %v29_v45 = vpack.c.bf16 %v28_v44, %v27_v43  ;;  %v120_v48 = vpack.c.bf16 %v106_v47, %v105_v46  ;;  %v104_v50 = vld [vmem:[%s584_s3 + $0x8] sm:$0xff]  ;;  %v190_v52 = vld [vmem:[%s586_s5 + $0x70] sm:$0xff]  ;;  %v191_v53 = vld [vmem:[%s586_s5 + $0x78] sm:$0xff] }
   0xd   :  { %290 = vmatprep.subr.bf16.mxu0 %v346_v0  ;;  %v119_v51 = vpack.c.bf16 %v104_v50, %v103_v49  ;;  %v188_v54 = vld [vmem:[%s586_s5 + $0x60] sm:$0xff]  ;;  %v199_v55 = vpack.c.bf16 %v191_v53, %v190_v52  ;;  %v189_v56 = vld [vmem:[%s586_s5 + $0x68] sm:$0xff]  ;;  %v186_v58 = vld [vmem:[%s586_s5 + $0x50] sm:$0xff] }
   0xe   :  { %309 = vmatpush3.bf16.msra.mxu1 %v124_v23  ;;  %v198_v57 = vpack.c.bf16 %v189_v56, %v188_v54  ;;  %v187_v59 = vld [vmem:[%s586_s5 + $0x58] sm:$0xff]  ;;  %v184_v61 = vld [vmem:[%s586_s5 + $0x40] sm:$0xff]  ;;  %v185_v62 = vld [vmem:[%s586_s5 + $0x48] sm:$0xff] }
   0xf   :  { %310 = vmatprep.subr.bf16.mxu1 %v346_v0  ;;  %v197_v60 = vpack.c.bf16 %v187_v59, %v186_v58  ;;  %v196_v63 = vpack.c.bf16 %v185_v62, %v184_v61  ;;  %v182_v1 = vld [vmem:[%s586_s5 + $0x30] sm:$0xff]  ;;  %v183_v2 = vld [vmem:[%s586_s5 + $0x38] sm:$0xff]  ;;  %v180_v4 = vld [vmem:[%s586_s5 + $0x20] sm:$0xff] }
  0x10   :  { %291 = vmatpush3.bf16.msra.mxu0 %v50_v20  ;;  %v195_v3 = vpack.c.bf16 %v183_v2, %v182_v1  ;;  %v181_v5 = vld [vmem:[%s586_s5 + $0x28] sm:$0xff]  ;;  %v254_v8 = vld [vmem:[%s587_s2] ss:$0 sm:$0xff]  ;;  %v178_v15 = vld [vmem:[%s586_s5 + $0x10] sm:$0xff] }
  0x11   :  { %292 = vmatprep.subr.bf16.mxu0 %v346_v0  ;;  %v194_v6 = vpack.c.bf16 %v181_v5, %v180_v4  ;;  %v179_v16 = vld [vmem:[%s586_s5 + $0x18] sm:$0xff]  ;;  %v176_v18 = vld [vmem:[%s586_s5] sm:$0xff]  ;;  %v177_v19 = vld [vmem:[%s586_s5 + $0x8] sm:$0xff] }
  0x12   :  { %311 = vmatpush3.bf16.msra.mxu1 %v123_v29  ;;  %v193_v17 = vpack.c.bf16 %v179_v16, %v178_v15  ;;  %v192_v20 = vpack.c.bf16 %v177_v19, %v176_v18  ;;  %v255_v22 = vld [vmem:[%s588_s4] ss:$0 sm:$0xff] }
  0x13   :  { %312 = vmatprep.subr.bf16.mxu1 %v346_v0  ;;  %v256_v28 = vld [vmem:[%s589_s6] ss:$0 sm:$0xff] }
  0x14   :  { %293 = vmatpush3.bf16.msra.mxu0 %v49_v26 }
  0x15   :  { %294 = vmatprep.subr.bf16.mxu0 %v346_v0 }
  0x16   :  { %313 = vmatpush3.bf16.msra.mxu1 %v122_v35 }
  0x17   :  { %314 = vmatprep.subr.bf16.mxu1 %v346_v0 }
  0x18   :  { %295 = vmatpush3.bf16.msra.mxu0 %v48_v32 }
  0x19   :  { %296 = vmatprep.subr.bf16.mxu0 %v346_v0 }
  0x1a   :  { %315 = vmatpush3.bf16.msra.mxu1 %v121_v41 }
  0x1b   :  { %316 = vmatprep.subr.bf16.mxu1 %v346_v0 }
  0x1c   :  { %297 = vmatpush3.bf16.msra.mxu0 %v47_v38 }
  0x1d   :  { %298 = vmatprep.subr.bf16.mxu0 %v346_v0 }
  0x1e   :  { %317 = vmatpush3.bf16.msra.mxu1 %v120_v48 }
  0x1f   :  { %318 = vmatprep.subr.bf16.mxu1 %v346_v0 }
  0x20   :  { %299 = vmatpush3.bf16.msra.mxu0 %v46_v42 }
  0x21   :  { %324 = vmatprep.subr.bf16.mxu0 %v346_v0 }
  0x22   :  { %319 = vmatpush3.bf16.msra.mxu1 %v119_v51 }
  0x23   :  { %301 = vmatmul.mubr.bf16.vlgmr.msra.gmra.mxu0 %v29_v45 }
  0x24   :  { %340 = vmatprep.mubr.msk.bf16.mxu0 %vm347_vm0, %v346_v0  ;;  %325 = vmatpush3.bf16.msra.mxu0 %v199_v55 }
  0x25   :  { %326 = vmatprep.subr.bf16.mxu0 %v346_v0 }
  0x28   :  { %327 = vmatpush3.bf16.msra.mxu0 %v198_v57 }
  0x29   :  { %328 = vmatprep.subr.bf16.mxu0 %v346_v0 }
  0x2c   :  { %329 = vmatpush3.bf16.msra.mxu0 %v197_v60 }
  0x2d   :  { %330 = vmatprep.subr.bf16.mxu0 %v346_v0 }
  0x30   :  { %331 = vmatpush3.bf16.msra.mxu0 %v196_v63 }
  0x31   :  { %332 = vmatprep.subr.bf16.mxu0 %v346_v0 }
  0x34   :  { %333 = vmatpush3.bf16.msra.mxu0 %v195_v3 }
  0x35   :  { %334 = vmatprep.subr.bf16.mxu0 %v346_v0 }
  0x38   :  { %335 = vmatpush3.bf16.msra.mxu0 %v194_v6 }
  0x39   :  { %336 = vmatprep.subr.bf16.mxu0 %v346_v0 }
  0x3c   :  { %337 = vmatpush3.bf16.msra.mxu0 %v193_v17 }
  0x3d   :  { %338 = vmatprep.subr.bf16.mxu0 %v346_v0 }
  0x40   :  { %339 = vmatpush3.bf16.msra.mxu0 %v192_v20 }
  0xe3   :  { %v95_v7 = vpop.f32.mrf.mxu0 }
  0xe4   :  { %v96_v11 = vadd.f32 %v254_v8, %v95_v7 }
  0xe5   :  { %v302_v9 = vpop.f32.mrf.mxu0 }
  0xe7   :  { %v98_v10 = vpop.f32.mrf.mxu0 }
  0xe8   :  { %v99_v12 = vadd.f32 %v254_v8, %v98_v10 }
  0xe9   :  { %v303_v13 = vpop.f32.mrf.mxu0 }
  0xea   :  { %v102_v14 = vpack.c.bf16 %v99_v12, %v96_v11 }
  0xec   :  { %321 = vmatmul.mubr.bf16.vlgmr.msra.gmra.mxu1 %v102_v14 }
 0x1ac   :  { %v168_v21 = vpop.f32.mrf.mxu1 }
 0x1ad   :  { %v169_v25 = vadd.f32 %v255_v22, %v168_v21 }
 0x1ae   :  { %v322_v23 = vpop.f32.mrf.mxu1 }
 0x1b0   :  { %v171_v24 = vpop.f32.mrf.mxu1 }
 0x1b1   :  { %v172_v26 = vadd.f32 %v255_v22, %v171_v24 }
 0x1b2   :  { %v323_v0 = vpop.f32.mrf.mxu1 }
 0x1b3   :  { %v175_v27 = vpack.c.bf16 %v172_v26, %v169_v25 }
 0x1b5   :  { %341 = vmatmul.mubr.bf16.vlgmr.msra.gmra.mxu0 %v175_v27 }
 0x275   :  { %v241_v29 = vpop.f32.mrf.mxu0 }
 0x276   :  { %v242_v30 = vadd.f32 %v256_v28, %v241_v29 }
 0x277   :  { %v342_v31 = vpop.f32.mrf.mxu0 }
 0x278   :  { %248 = vst [vmem:[%s590_s7] sm:$0xff] %v242_v30 }
 0x279   :  { %v244_v32 = vpop.f32.mrf.mxu0 }
 0x27a   :  { %v245_v33 = vadd.f32 %v256_v28, %v244_v32 }
 0x27b   :  { %v343_v34 = vpop.f32.mrf.mxu0 }
 0x27c   :  { %249 = vst [vmem:[%s590_s7 + $0x8] sm:$0xff] %v245_v33 }

// kernel: hgmae_forward.29
= control target key start
LH: loop header
LB: loop body
LE: loop exit
PB: predicated region body
PF: predicated region fallthrough
CT: control target
= control target key end

     0   :  { %s320_s0 = inlined_call_operand.vmem [shape: f32[128,128], index: 0, kind: input, shape index: {}]   ;;  %s321_s1 = inlined_call_operand.vmem [shape: f32[128,128], index: 1, kind: output, shape index: {}]  }
   0x1   :  { %v23_v0 = vld [vmem:[%s320_s0 + $0x70] sm:$0xff]  ;;  %v24_v1 = vld [vmem:[%s320_s0 + $0x78] sm:$0xff]  ;;  %v21_v2 = vld [vmem:[%s320_s0 + $0x60] sm:$0xff] }
   0x2   :  { %v32_v3 = vpack.c.bf16 %v24_v1, %v23_v0  ;;  %v22_v4 = vld [vmem:[%s320_s0 + $0x68] sm:$0xff]  ;;  %v17_v6 = vld [vmem:[%s320_s0 + $0x40] sm:$0xff]  ;;  %v19_v11 = vld [vmem:[%s320_s0 + $0x50] sm:$0xff] }
   0x3   :  { %v31_v5 = vpack.c.bf16 %v22_v4, %v21_v2  ;;  %v18_v7 = vld [vmem:[%s320_s0 + $0x48] sm:$0xff]  ;;  %v9_v9 = vld [vmem:[%s320_s0] sm:$0xff]  ;;  %v20_v12 = vld [vmem:[%s320_s0 + $0x58] sm:$0xff] }
   0x4   :  { %166 = vmatprep.subr.bf16.mxu0 %v32_v3  ;;  %198 = vmatprep.subr.bf16.mxu1 %v32_v3  ;;  %v29_v8 = vpack.c.bf16 %v18_v7, %v17_v6  ;;  %v10_v10 = vld [vmem:[%s320_s0 + $0x8] sm:$0xff]  ;;  %v30_v14 = vpack.c.bf16 %v20_v12, %v19_v11  ;;  %v15_v15 = vld [vmem:[%s320_s0 + $0x30] sm:$0xff]  ;;  %v16_v16 = vld [vmem:[%s320_s0 + $0x38] sm:$0xff] }
   0x5   :  { %167 = vmatpush3.bf16.xpose.msra.mxu0 %v32_v3  ;;  %206 = vmatpush3.bf16.xpose.msra.mxu1 %v32_v3  ;;  %v25_v13 = vpack.c.bf16 %v10_v10, %v9_v9  ;;  %v28_v17 = vpack.c.bf16 %v16_v16, %v15_v15  ;;  %v13_v18 = vld [vmem:[%s320_s0 + $0x20] sm:$0xff]  ;;  %v14_v19 = vld [vmem:[%s320_s0 + $0x28] sm:$0xff]  ;;  %v11_v21 = vld [vmem:[%s320_s0 + $0x10] sm:$0xff] }
   0x6   :  { %168 = vmatprep.subr.bf16.mxu0 %v31_v5  ;;  %199 = vmatprep.subr.bf16.mxu1 %v31_v5  ;;  %v27_v20 = vpack.c.bf16 %v14_v19, %v13_v18  ;;  %v12_v22 = vld [vmem:[%s320_s0 + $0x18] sm:$0xff] }
   0x7   :  { %190 = vmatprep.mubr.bf16.mxu1 %v29_v8  ;;  %182 = vmatprep.mubr.bf16.mxu0 %v25_v13  ;;  %v26_v23 = vpack.c.bf16 %v12_v22, %v11_v21 }
   0xd   :  { %169 = vmatpush3.bf16.xpose.msra.mxu0 %v31_v5  ;;  %207 = vmatpush3.bf16.xpose.msra.mxu1 %v31_v5 }
   0xe   :  { %170 = vmatprep.subr.bf16.mxu0 %v30_v14  ;;  %200 = vmatprep.subr.bf16.mxu1 %v30_v14 }
  0x15   :  { %171 = vmatpush3.bf16.xpose.msra.mxu0 %v30_v14  ;;  %208 = vmatpush3.bf16.xpose.msra.mxu1 %v30_v14 }
  0x16   :  { %172 = vmatprep.subr.bf16.mxu0 %v29_v8  ;;  %201 = vmatprep.subr.bf16.mxu1 %v29_v8 }
  0x1d   :  { %173 = vmatpush3.bf16.xpose.msra.mxu0 %v29_v8  ;;  %209 = vmatpush3.bf16.xpose.msra.mxu1 %v29_v8 }
  0x1e   :  { %174 = vmatprep.subr.bf16.mxu0 %v28_v17  ;;  %202 = vmatprep.subr.bf16.mxu1 %v28_v17 }
  0x25   :  { %175 = vmatpush3.bf16.xpose.msra.mxu0 %v28_v17  ;;  %210 = vmatpush3.bf16.xpose.msra.mxu1 %v28_v17 }
  0x26   :  { %176 = vmatprep.subr.bf16.mxu0 %v27_v20  ;;  %203 = vmatprep.subr.bf16.mxu1 %v27_v20 }
  0x2d   :  { %177 = vmatpush3.bf16.xpose.msra.mxu0 %v27_v20  ;;  %211 = vmatpush3.bf16.xpose.msra.mxu1 %v27_v20 }
  0x2e   :  { %178 = vmatprep.subr.bf16.mxu0 %v26_v23  ;;  %204 = vmatprep.subr.bf16.mxu1 %v26_v23 }
  0x35   :  { %179 = vmatpush3.bf16.xpose.msra.mxu0 %v26_v23  ;;  %212 = vmatpush3.bf16.xpose.msra.mxu1 %v26_v23 }
  0x36   :  { %180 = vmatprep.subr.bf16.mxu0 %v25_v13  ;;  %205 = vmatprep.subr.bf16.mxu1 %v25_v13 }
  0x3d   :  { %181 = vmatpush3.bf16.xpose.msra.mxu0 %v25_v13  ;;  %213 = vmatpush3.bf16.xpose.msra.mxu1 %v25_v13 }
  0x44   :  { %183 = vmatmul.mubr.bf16.vlgmr.msra.gmra.mxu0 %v26_v23  ;;  %191 = vmatmul.mubr.bf16.vlgmr.msra.gmra.mxu1 %v30_v14 }
  0x45   :  { %186 = vmatprep.mubr.bf16.mxu0 %v27_v20  ;;  %194 = vmatprep.mubr.bf16.mxu1 %v31_v5 }
  0x4c   :  { %187 = vmatmul.mubr.bf16.gmra.mxu0 %v28_v17  ;;  %195 = vmatmul.mubr.bf16.gmra.mxu1 %v32_v3 }
 0x104   :  { %v184_v24 = vpop.f32.mrf.mxu0  ;;  %v192_v25 = vpop.f32.mrf.mxu1 }
 0x105   :  { %132 = vst [vmem:[%s321_s1 + $0x10] sm:$0xff] %v184_v24  ;;  %140 = vst [vmem:[%s321_s1 + $0x50] sm:$0xff] %v192_v25 }
 0x106   :  { %v67_v26 = vpop.f32.mrf.mxu0  ;;  %v99_v27 = vpop.f32.mrf.mxu1 }
 0x107   :  { %130 = vst [vmem:[%s321_s1] sm:$0xff] %v67_v26  ;;  %138 = vst [vmem:[%s321_s1 + $0x40] sm:$0xff] %v99_v27 }
 0x108   :  { %v185_v28 = vpop.f32.mrf.mxu0  ;;  %v193_v29 = vpop.f32.mrf.mxu1 }
 0x109   :  { %133 = vst [vmem:[%s321_s1 + $0x18] sm:$0xff] %v185_v28  ;;  %141 = vst [vmem:[%s321_s1 + $0x58] sm:$0xff] %v193_v29 }
 0x10a   :  { %v70_v30 = vpop.f32.mrf.mxu0  ;;  %v102_v31 = vpop.f32.mrf.mxu1 }
 0x10b   :  { %131 = vst [vmem:[%s321_s1 + $0x8] sm:$0xff] %v70_v30  ;;  %139 = vst [vmem:[%s321_s1 + $0x48] sm:$0xff] %v102_v31 }
 0x10c   :  { %v188_v32 = vpop.f32.mrf.mxu0  ;;  %v196_v33 = vpop.f32.mrf.mxu1 }
 0x10d   :  { %136 = vst [vmem:[%s321_s1 + $0x30] sm:$0xff] %v188_v32  ;;  %144 = vst [vmem:[%s321_s1 + $0x70] sm:$0xff] %v196_v33 }
 0x10e   :  { %v83_v34 = vpop.f32.mrf.mxu0  ;;  %v115_v35 = vpop.f32.mrf.mxu1 }
 0x10f   :  { %134 = vst [vmem:[%s321_s1 + $0x20] sm:$0xff] %v83_v34  ;;  %142 = vst [vmem:[%s321_s1 + $0x60] sm:$0xff] %v115_v35 }
 0x110   :  { %v189_v36 = vpop.f32.mrf.mxu0  ;;  %v197_v37 = vpop.f32.mrf.mxu1 }
 0x111   :  { %137 = vst [vmem:[%s321_s1 + $0x38] sm:$0xff] %v189_v36  ;;  %145 = vst [vmem:[%s321_s1 + $0x78] sm:$0xff] %v197_v37 }
 0x112   :  { %v86_v38 = vpop.f32.mrf.mxu0  ;;  %v118_v39 = vpop.f32.mrf.mxu1 }
 0x113   :  { %135 = vst [vmem:[%s321_s1 + $0x28] sm:$0xff] %v86_v38  ;;  %143 = vst [vmem:[%s321_s1 + $0x68] sm:$0xff] %v118_v39 }

// kernel: hgmae_forward.36
= control target key start
LH: loop header
LB: loop body
LE: loop exit
PB: predicated region body
PF: predicated region fallthrough
CT: control target
= control target key end

     0   :  { %v275_v3 = vmov 0.0   ;;  %vm276_vm0 = vmmov 0   ;;  %s439_s0 = inlined_call_operand.vmem [shape: f32[16,128], index: 0, kind: input, shape index: {}]   ;;  %s440_s1 = inlined_call_operand.vmem [shape: f32[128,128], index: 1, kind: input, shape index: {}]   ;;  %s441_s2 = inlined_call_operand.vmem [shape: f32[1,128], index: 2, kind: input, shape index: {}]   ;;  %s442_s3 = inlined_call_operand.vmem [shape: f32[128,128], index: 3, kind: input, shape index: {}]   ;;  %s443_s4 = inlined_call_operand.vmem [shape: f32[1,128], index: 4, kind: input, shape index: {}]   ;;  %s444_s5 = inlined_call_operand.hbm [shape: f32[16,128], index: 5, kind: output, shape index: {}]  }
   0x1   :  { %v39_v0 = vld [vmem:[%s440_s1 + $0x70] sm:$0xff]  ;;  %v40_v1 = vld [vmem:[%s440_s1 + $0x78] sm:$0xff]  ;;  %v37_v2 = vld [vmem:[%s440_s1 + $0x60] sm:$0xff]  ;;  %208 = vmatprep.subr.bf16.mxu0 %v275_v3  ;;  %224 = vmatprep.mubr.msk.bf16.mxu0 %vm276_vm0, %v275_v3 }
   0x2   :  { %v48_v4 = vpack.c.bf16 %v40_v1, %v39_v0  ;;  %v38_v5 = vld [vmem:[%s440_s1 + $0x68] sm:$0xff]  ;;  %228 = vmatprep.subr.bf16.mxu1 %v275_v3  ;;  %244 = vmatprep.mubr.msk.bf16.mxu1 %vm276_vm0, %v275_v3  ;;  %v35_v7 = vld [vmem:[%s440_s1 + $0x50] sm:$0xff]  ;;  %v36_v8 = vld [vmem:[%s440_s1 + $0x58] sm:$0xff] }
   0x3   :  { %v47_v6 = vpack.c.bf16 %v38_v5, %v37_v2  ;;  %v112_v9 = vld [vmem:[%s442_s3 + $0x70] sm:$0xff]  ;;  %v113_v10 = vld [vmem:[%s442_s3 + $0x78] sm:$0xff]  ;;  %v110_v11 = vld [vmem:[%s442_s3 + $0x60] sm:$0xff]  ;;  %v46_v12 = vpack.c.bf16 %v36_v8, %v35_v7 }
   0x4   :  { %209 = vmatpush3.bf16.msra.mxu0 %v48_v4  ;;  %v121_v13 = vpack.c.bf16 %v113_v10, %v112_v9  ;;  %v111_v14 = vld [vmem:[%s442_s3 + $0x68] sm:$0xff]  ;;  %v33_v15 = vld [vmem:[%s440_s1 + $0x40] sm:$0xff]  ;;  %v108_v18 = vld [vmem:[%s442_s3 + $0x50] sm:$0xff] }
   0x5   :  { %210 = vmatprep.subr.bf16.mxu0 %v275_v3  ;;  %v34_v16 = vld [vmem:[%s440_s1 + $0x48] sm:$0xff]  ;;  %v120_v17 = vpack.c.bf16 %v111_v14, %v110_v11  ;;  %v109_v19 = vld [vmem:[%s442_s3 + $0x58] sm:$0xff] }
   0x6   :  { %229 = vmatpush3.bf16.msra.mxu1 %v121_v13 }
   0x7   :  { %230 = vmatprep.subr.bf16.mxu1 %v275_v3 }
   0x8   :  { %211 = vmatpush3.bf16.msra.mxu0 %v47_v6 }
   0x9   :  { %212 = vmatprep.subr.bf16.mxu0 %v275_v3 }
   0xa   :  { %10 = vsyncpa [#allocation3], 0  ;;  %v45_v20 = vpack.c.bf16 %v34_v16, %v33_v15  ;;  %v31_v21 = vld [vmem:[%s440_s1 + $0x30] sm:$0xff]  ;;  %v32_v22 = vld [vmem:[%s440_s1 + $0x38] sm:$0xff]  ;;  %231 = vmatpush3.bf16.msra.mxu1 %v120_v17  ;;  %v119_v23 = vpack.c.bf16 %v109_v19, %v108_v18 }
   0xb   :  { %232 = vmatprep.subr.bf16.mxu1 %v275_v3  ;;  %v106_v24 = vld [vmem:[%s442_s3 + $0x40] sm:$0xff]  ;;  %v107_v25 = vld [vmem:[%s442_s3 + $0x48] sm:$0xff]  ;;  %v44_v26 = vpack.c.bf16 %v32_v22, %v31_v21  ;;  %v104_v30 = vld [vmem:[%s442_s3 + $0x30] sm:$0xff] }
   0xc   :  { %213 = vmatpush3.bf16.msra.mxu0 %v46_v12  ;;  %v29_v27 = vld [vmem:[%s440_s1 + $0x20] sm:$0xff]  ;;  %v30_v28 = vld [vmem:[%s440_s1 + $0x28] sm:$0xff]  ;;  %v118_v29 = vpack.c.bf16 %v107_v25, %v106_v24  ;;  %v105_v31 = vld [vmem:[%s442_s3 + $0x38] sm:$0xff] }
   0xd   :  { %214 = vmatprep.subr.bf16.mxu0 %v275_v3  ;;  %v43_v32 = vpack.c.bf16 %v30_v28, %v29_v27  ;;  %v27_v33 = vld [vmem:[%s440_s1 + $0x10] sm:$0xff]  ;;  %v28_v34 = vld [vmem:[%s440_s1 + $0x18] sm:$0xff]  ;;  %v117_v35 = vpack.c.bf16 %v105_v31, %v104_v30  ;;  %v102_v36 = vld [vmem:[%s442_s3 + $0x20] sm:$0xff] }
   0xe   :  { %233 = vmatpush3.bf16.msra.mxu1 %v119_v23  ;;  %v103_v37 = vld [vmem:[%s442_s3 + $0x28] sm:$0xff]  ;;  %v42_v38 = vpack.c.bf16 %v28_v34, %v27_v33  ;;  %v25_v39 = vld [vmem:[%s440_s1] sm:$0xff]  ;;  %v100_v46 = vld [vmem:[%s442_s3 + $0x10] sm:$0xff] }
   0xf   :  { %234 = vmatprep.subr.bf16.mxu1 %v275_v3  ;;  %v26_v40 = vld [vmem:[%s440_s1 + $0x8] sm:$0xff]  ;;  %v116_v41 = vpack.c.bf16 %v103_v37, %v102_v36  ;;  %v22_v43 = vld [vmem:[%s439_s0] sm:$0xff]  ;;  %v101_v47 = vld [vmem:[%s442_s3 + $0x18] sm:$0xff] }
  0x10   :  { %215 = vmatpush3.bf16.msra.mxu0 %v45_v20  ;;  %v41_v42 = vpack.c.bf16 %v26_v40, %v25_v39  ;;  %v23_v44 = vld [vmem:[%s439_s0 + $0x8] sm:$0xff]  ;;  %v115_v48 = vpack.c.bf16 %v101_v47, %v100_v46  ;;  %v98_v49 = vld [vmem:[%s442_s3] sm:$0xff] }
  0x11   :  { %216 = vmatprep.subr.bf16.mxu0 %v275_v3  ;;  %v24_v45 = vpack.c.bf16 %v23_v44, %v22_v43  ;;  %v99_v50 = vld [vmem:[%s442_s3 + $0x8] sm:$0xff]  ;;  %v188_v53 = vld [vmem:[%s441_s2] ss:$0 sm:$0xff]  ;;  %s277_s3 = smov [#allocation2]  }
  0x12   :  { %235 = vmatpush3.bf16.msra.mxu1 %v118_v29  ;;  %v114_v51 = vpack.c.bf16 %v99_v50, %v98_v49  ;;  %v189_v60 = vld [vmem:[%s443_s4] ss:$0 sm:$0xff]  ;;  %s177_s13 = sshll.u32 %s277_s3, 4  ;;  %s178_s13 = int_to_ptr.vmem [resolvable:$true] %s177_s13 }
  0x13   :  { %236 = vmatprep.subr.bf16.mxu1 %v275_v3  ;;  %s253_s2 = scalar_lea.vmem %s178_s13, 256  ;;  %p258_p1 = scmp.lt.s32.totalorder %s178_s13, %s178_s13 }
  0x14   :  { %217 = vmatpush3.bf16.msra.mxu0 %v44_v26  ;;  %p254_p0 = scmp.ne.s32.totalorder %s178_s13, %s253_s2  ;;  %p259_p2 = scmp.lt.s32.totalorder %s253_s2, %s253_s2 }
  0x15   :  { %218 = vmatprep.subr.bf16.mxu0 %v275_v3 }
  0x16   :  { %237 = vmatpush3.bf16.msra.mxu1 %v117_v35  ;;  %p260_p3 = por %p259_p2, %p258_p1 }
  0x17   :  { %238 = vmatprep.subr.bf16.mxu1 %v275_v3 }
  0x18   :  { %219 = vmatpush3.bf16.msra.mxu0 %v43_v32  ;;  %p261_p4 = pnand %p260_p3, %p254_p0 }
  0x19   :  { %220 = vmatprep.subr.bf16.mxu0 %v275_v3 }
  0x1a   :  { %239 = vmatpush3.bf16.msra.mxu1 %v116_v41 }
  0x1b   :  { %240 = vmatprep.subr.bf16.mxu1 %v275_v3 }
  0x1c   :  { %221 = vmatpush3.bf16.msra.mxu0 %v42_v38 }
  0x1d   :  { %222 = vmatprep.subr.bf16.mxu0 %v275_v3 }
  0x1e   :  { %241 = vmatpush3.bf16.msra.mxu1 %v115_v48 }
  0x1f   :  { %242 = vmatprep.subr.bf16.mxu1 %v275_v3 }
  0x20   :  { %223 = vmatpush3.bf16.msra.mxu0 %v41_v42 }
  0x22   :  { %243 = vmatpush3.bf16.msra.mxu1 %v114_v51 }
  0x23   :  { %225 = vmatmul.mubr.bf16.vlgmr.msra.gmra.mxu0 %v24_v45 }
  0xe3   :  { %v90_v52 = vpop.f32.mrf.mxu0 }
  0xe4   :  { %v91_v56 = vadd.f32 %v188_v53, %v90_v52 }
  0xe5   :  { %v226_v54 = vpop.f32.mrf.mxu0 }
  0xe7   :  { %v93_v55 = vpop.f32.mrf.mxu0 }
  0xe8   :  { %v94_v57 = vadd.f32 %v188_v53, %v93_v55 }
  0xe9   :  { %v227_v58 = vpop.f32.mrf.mxu0 }
  0xea   :  { %v97_v59 = vpack.c.bf16 %v94_v57, %v91_v56 }
  0xec   :  { %245 = vmatmul.mubr.bf16.vlgmr.msra.gmra.mxu1 %v97_v59 }
 0x1ac   :  { %v163_v61 = vpop.f32.mrf.mxu1 }
 0x1ad   :  { %v164_v62 = vadd.f32 %v189_v60, %v163_v61 }
 0x1ae   :  { %v246_v63 = vpop.f32.mrf.mxu1 }
 0x1af   :  { %170 = vst [vmem:[#allocation2] sm:$0xff] %v164_v62 }
 0x1b0   :  { %v166_v0 = vpop.f32.mrf.mxu1 }
 0x1b1   :  { %v167_v1 = vadd.f32 %v189_v60, %v166_v0 }
 0x1b2   :  { %v247_v2 = vpop.f32.mrf.mxu1 }
 0x1b3   :  { %171 = vst [vmem:[#allocation2 + $0x8] sm:$0xff] %v167_v1 }
 0x1b4   :  { %264 = shalt.err (!%p261_p4)
}
 0x1b5   :  { %s278_s14 = smov 128   ;;  %s279_s4 = smov 8  }
 0x1b6   :  { %183 = dma.vmem_to_hbm [thread:$0]  %s178_s13, 256, %s444_s5, [#allocation3], %s278_s14, %s278_s14, %s279_s4  }
 0x1b7   :  { %273 = dma.done.wait [#allocation3], 256  }
 0x1b8   :  { %274 = vsyncadd [#allocation3], 4294967040 }
 0x1b9   :  { %187 = vsyncpa [#allocation3], 1 }

// kernel: hgmae_forward.38
= control target key start
LH: loop header
LB: loop body
LE: loop exit
PB: predicated region body
PF: predicated region fallthrough
CT: control target
= control target key end

     0   :  { %v396_v3 = vmov 0.0   ;;  %vm397_vm0 = vmmov 0   ;;  %s633_s0 = inlined_call_operand.vmem [shape: f32[16,128], index: 0, kind: input, shape index: {}]   ;;  %s634_s1 = inlined_call_operand.vmem [shape: f32[128,128], index: 1, kind: input, shape index: {}]   ;;  %s635_s2 = inlined_call_operand.vmem [shape: f32[1,128], index: 2, kind: input, shape index: {}]   ;;  %s636_s3 = inlined_call_operand.vmem [shape: f32[128,128], index: 3, kind: input, shape index: {}]   ;;  %s637_s4 = inlined_call_operand.vmem [shape: f32[1,128], index: 4, kind: input, shape index: {}]   ;;  %s638_s5 = inlined_call_operand.vmem [shape: f32[128,128], index: 5, kind: input, shape index: {}]   ;;  %s639_s6 = inlined_call_operand.vmem [shape: f32[1,128], index: 6, kind: input, shape index: {}]   ;;  %s640_s7 = inlined_call_operand.hbm [shape: f32[16,128], index: 7, kind: output, shape index: {}]  }
   0x1   :  { %v45_v0 = vld [vmem:[%s634_s1 + $0x70] sm:$0xff]  ;;  %v46_v1 = vld [vmem:[%s634_s1 + $0x78] sm:$0xff]  ;;  %v43_v2 = vld [vmem:[%s634_s1 + $0x60] sm:$0xff]  ;;  %309 = vmatprep.subr.bf16.mxu0 %v396_v3  ;;  %325 = vmatprep.mubr.msk.bf16.mxu0 %vm397_vm0, %v396_v3 }
   0x2   :  { %v54_v4 = vpack.c.bf16 %v46_v1, %v45_v0  ;;  %v44_v5 = vld [vmem:[%s634_s1 + $0x68] sm:$0xff]  ;;  %329 = vmatprep.subr.bf16.mxu1 %v396_v3  ;;  %345 = vmatprep.mubr.msk.bf16.mxu1 %vm397_vm0, %v396_v3  ;;  %v41_v7 = vld [vmem:[%s634_s1 + $0x50] sm:$0xff]  ;;  %v42_v8 = vld [vmem:[%s634_s1 + $0x58] sm:$0xff] }
   0x3   :  { %v53_v6 = vpack.c.bf16 %v44_v5, %v43_v2  ;;  %v124_v9 = vld [vmem:[%s636_s3 + $0x70] sm:$0xff]  ;;  %v125_v10 = vld [vmem:[%s636_s3 + $0x78] sm:$0xff]  ;;  %v122_v11 = vld [vmem:[%s636_s3 + $0x60] sm:$0xff]  ;;  %v52_v12 = vpack.c.bf16 %v42_v8, %v41_v7 }
   0x4   :  { %310 = vmatpush3.bf16.msra.mxu0 %v54_v4  ;;  %v133_v13 = vpack.c.bf16 %v125_v10, %v124_v9  ;;  %v123_v14 = vld [vmem:[%s636_s3 + $0x68] sm:$0xff]  ;;  %v39_v15 = vld [vmem:[%s634_s1 + $0x40] sm:$0xff] }
   0x5   :  { %311 = vmatprep.subr.bf16.mxu0 %v396_v3  ;;  %v40_v16 = vld [vmem:[%s634_s1 + $0x48] sm:$0xff]  ;;  %v132_v17 = vpack.c.bf16 %v123_v14, %v122_v11 }
   0x6   :  { %330 = vmatpush3.bf16.msra.mxu1 %v133_v13 }
   0x8   :  { %312 = vmatpush3.bf16.msra.mxu0 %v53_v6 }
   0x9   :  { %313 = vmatprep.subr.bf16.mxu0 %v396_v3 }
   0xa   :  { %12 = vsyncpa [#allocation3], 0  ;;  %331 = vmatprep.subr.bf16.mxu1 %v396_v3  ;;  %v120_v18 = vld [vmem:[%s636_s3 + $0x50] sm:$0xff]  ;;  %v121_v19 = vld [vmem:[%s636_s3 + $0x58] sm:$0xff]  ;;  %v51_v20 = vpack.c.bf16 %v40_v16, %v39_v15 }
   0xb   :  { %v37_v21 = vld [vmem:[%s634_s1 + $0x30] sm:$0xff]  ;;  %v38_v22 = vld [vmem:[%s634_s1 + $0x38] sm:$0xff]  ;;  %332 = vmatpush3.bf16.msra.mxu1 %v132_v17  ;;  %v131_v23 = vpack.c.bf16 %v121_v19, %v120_v18  ;;  %v118_v24 = vld [vmem:[%s636_s3 + $0x40] sm:$0xff] }
   0xc   :  { %314 = vmatpush3.bf16.msra.mxu0 %v52_v12  ;;  %333 = vmatprep.subr.bf16.mxu1 %v396_v3  ;;  %v119_v25 = vld [vmem:[%s636_s3 + $0x48] sm:$0xff]  ;;  %v50_v26 = vpack.c.bf16 %v38_v22, %v37_v21  ;;  %v35_v27 = vld [vmem:[%s634_s1 + $0x20] sm:$0xff]  ;;  %v116_v30 = vld [vmem:[%s636_s3 + $0x30] sm:$0xff] }
   0xd   :  { %315 = vmatprep.subr.bf16.mxu0 %v396_v3  ;;  %v36_v28 = vld [vmem:[%s634_s1 + $0x28] sm:$0xff]  ;;  %v130_v29 = vpack.c.bf16 %v119_v25, %v118_v24  ;;  %v117_v31 = vld [vmem:[%s636_s3 + $0x38] sm:$0xff]  ;;  %v33_v33 = vld [vmem:[%s634_s1 + $0x10] sm:$0xff] }
   0xe   :  { %v49_v32 = vpack.c.bf16 %v36_v28, %v35_v27  ;;  %v34_v34 = vld [vmem:[%s634_s1 + $0x18] sm:$0xff]  ;;  %v129_v35 = vpack.c.bf16 %v117_v31, %v116_v30  ;;  %v31_v37 = vld [vmem:[%s634_s1] sm:$0xff]  ;;  %v32_v38 = vld [vmem:[%s634_s1 + $0x8] sm:$0xff] }
   0xf   :  { %334 = vmatpush3.bf16.msra.mxu1 %v131_v23  ;;  %v48_v36 = vpack.c.bf16 %v34_v34, %v33_v33  ;;  %v47_v39 = vpack.c.bf16 %v32_v38, %v31_v37  ;;  %v28_v40 = vld [vmem:[%s633_s0] sm:$0xff]  ;;  %v29_v41 = vld [vmem:[%s633_s0 + $0x8] sm:$0xff]  ;;  %v112_v46 = vld [vmem:[%s636_s3 + $0x10] sm:$0xff] }
  0x10   :  { %316 = vmatpush3.bf16.msra.mxu0 %v51_v20  ;;  %335 = vmatprep.subr.bf16.mxu1 %v396_v3  ;;  %v30_v42 = vpack.c.bf16 %v29_v41, %v28_v40  ;;  %v114_v43 = vld [vmem:[%s636_s3 + $0x20] sm:$0xff]  ;;  %v115_v44 = vld [vmem:[%s636_s3 + $0x28] sm:$0xff]  ;;  %v113_v47 = vld [vmem:[%s636_s3 + $0x18] sm:$0xff] }
  0x11   :  { %317 = vmatprep.subr.bf16.mxu0 %v396_v3  ;;  %v128_v45 = vpack.c.bf16 %v115_v44, %v114_v43  ;;  %v127_v48 = vpack.c.bf16 %v113_v47, %v112_v46  ;;  %v110_v49 = vld [vmem:[%s636_s3] sm:$0xff]  ;;  %v111_v50 = vld [vmem:[%s636_s3 + $0x8] sm:$0xff]  ;;  %v203_v52 = vld [vmem:[%s638_s5 + $0x70] sm:$0xff] }
  0x12   :  { %v126_v51 = vpack.c.bf16 %v111_v50, %v110_v49  ;;  %v204_v53 = vld [vmem:[%s638_s5 + $0x78] sm:$0xff]  ;;  %v201_v54 = vld [vmem:[%s638_s5 + $0x60] sm:$0xff]  ;;  %v202_v56 = vld [vmem:[%s638_s5 + $0x68] sm:$0xff] }
  0x13   :  { %336 = vmatpush3.bf16.msra.mxu1 %v130_v29  ;;  %v212_v55 = vpack.c.bf16 %v204_v53, %v203_v52  ;;  %v211_v57 = vpack.c.bf16 %v202_v56, %v201_v54  ;;  %v199_v58 = vld [vmem:[%s638_s5 + $0x50] sm:$0xff]  ;;  %v200_v59 = vld [vmem:[%s638_s5 + $0x58] sm:$0xff]  ;;  %v197_v61 = vld [vmem:[%s638_s5 + $0x40] sm:$0xff] }
  0x14   :  { %318 = vmatpush3.bf16.msra.mxu0 %v50_v26  ;;  %337 = vmatprep.subr.bf16.mxu1 %v396_v3  ;;  %v210_v60 = vpack.c.bf16 %v200_v59, %v199_v58  ;;  %v198_v62 = vld [vmem:[%s638_s5 + $0x48] sm:$0xff]  ;;  %v195_v0 = vld [vmem:[%s638_s5 + $0x30] sm:$0xff]  ;;  %v196_v1 = vld [vmem:[%s638_s5 + $0x38] sm:$0xff] }
  0x15   :  { %319 = vmatprep.subr.bf16.mxu0 %v396_v3  ;;  %v209_v63 = vpack.c.bf16 %v198_v62, %v197_v61  ;;  %v208_v2 = vpack.c.bf16 %v196_v1, %v195_v0  ;;  %v279_v4 = vld [vmem:[%s635_s2] ss:$0 sm:$0xff]  ;;  %v194_v17 = vld [vmem:[%s638_s5 + $0x28] sm:$0xff]  ;;  %v191_v19 = vld [vmem:[%s638_s5 + $0x10] sm:$0xff] }
  0x16   :  { %v193_v16 = vld [vmem:[%s638_s5 + $0x20] sm:$0xff]  ;;  %v192_v20 = vld [vmem:[%s638_s5 + $0x18] sm:$0xff]  ;;  %v190_v23 = vld [vmem:[%s638_s5 + $0x8] sm:$0xff] }
  0x17   :  { %338 = vmatpush3.bf16.msra.mxu1 %v129_v35  ;;  %v207_v18 = vpack.c.bf16 %v194_v17, %v193_v16  ;;  %v206_v21 = vpack.c.bf16 %v192_v20, %v191_v19  ;;  %v189_v22 = vld [vmem:[%s638_s5] sm:$0xff] }
  0x18   :  { %320 = vmatpush3.bf16.msra.mxu0 %v49_v32  ;;  %339 = vmatprep.subr.bf16.mxu1 %v396_v3  ;;  %v205_v24 = vpack.c.bf16 %v190_v23, %v189_v22  ;;  %v280_v25 = vld [vmem:[%s637_s4] ss:$0 sm:$0xff]  ;;  %s398_s4 = smov [#allocation2]  }
  0x19   :  { %321 = vmatprep.subr.bf16.mxu0 %v396_v3  ;;  %s268_s30 = sshll.u32 %s398_s4, 4  ;;  %s269_s30 = int_to_ptr.vmem [resolvable:$true] %s268_s30 }
  0x1a   :  { %s374_s8 = scalar_lea.vmem %s269_s30, 256  ;;  %p379_p1 = scmp.lt.s32.totalorder %s269_s30, %s269_s30 }
  0x1b   :  { %340 = vmatpush3.bf16.msra.mxu1 %v128_v45  ;;  %p375_p0 = scmp.ne.s32.totalorder %s269_s30, %s374_s8  ;;  %p380_p2 = scmp.lt.s32.totalorder %s374_s8, %s374_s8 }
  0x1c   :  { %322 = vmatpush3.bf16.msra.mxu0 %v48_v36  ;;  %341 = vmatprep.subr.bf16.mxu1 %v396_v3  ;;  %v281_v36 = vld [vmem:[%s639_s6] ss:$0 sm:$0xff] }
  0x1d   :  { %323 = vmatprep.subr.bf16.mxu0 %v396_v3  ;;  %p381_p3 = por %p380_p2, %p379_p1 }
  0x1f   :  { %342 = vmatpush3.bf16.msra.mxu1 %v127_v48  ;;  %p382_p4 = pnand %p381_p3, %p375_p0 }
  0x20   :  { %324 = vmatpush3.bf16.msra.mxu0 %v47_v39  ;;  %343 = vmatprep.subr.bf16.mxu1 %v396_v3 }
  0x21   :  { %349 = vmatprep.subr.bf16.mxu0 %v396_v3 }
  0x23   :  { %326 = vmatmul.mubr.bf16.vlgmr.msra.gmra.mxu0 %v30_v42  ;;  %344 = vmatpush3.bf16.msra.mxu1 %v126_v51 }
  0x24   :  { %365 = vmatprep.mubr.msk.bf16.mxu0 %vm397_vm0, %v396_v3  ;;  %350 = vmatpush3.bf16.msra.mxu0 %v212_v55 }
  0x25   :  { %351 = vmatprep.subr.bf16.mxu0 %v396_v3 }
  0x28   :  { %352 = vmatpush3.bf16.msra.mxu0 %v211_v57 }
  0x29   :  { %353 = vmatprep.subr.bf16.mxu0 %v396_v3 }
  0x2c   :  { %354 = vmatpush3.bf16.msra.mxu0 %v210_v60 }
  0x2d   :  { %355 = vmatprep.subr.bf16.mxu0 %v396_v3 }
  0x30   :  { %356 = vmatpush3.bf16.msra.mxu0 %v209_v63 }
  0x31   :  { %357 = vmatprep.subr.bf16.mxu0 %v396_v3 }
  0x34   :  { %358 = vmatpush3.bf16.msra.mxu0 %v208_v2 }
  0x35   :  { %359 = vmatprep.subr.bf16.mxu0 %v396_v3 }
  0x38   :  { %360 = vmatpush3.bf16.msra.mxu0 %v207_v18 }
  0x39   :  { %361 = vmatprep.subr.bf16.mxu0 %v396_v3 }
  0x3c   :  { %362 = vmatpush3.bf16.msra.mxu0 %v206_v21 }
  0x3d   :  { %363 = vmatprep.subr.bf16.mxu0 %v396_v3 }
  0x40   :  { %364 = vmatpush3.bf16.msra.mxu0 %v205_v24 }
  0xe3   :  { %v96_v5 = vpop.f32.mrf.mxu0 }
  0xe4   :  { %v97_v6 = vadd.f32 %v279_v4, %v96_v5 }
  0xe5   :  { %v327_v7 = vpop.f32.mrf.mxu0 }
  0xe6   :  { %v105_v9 = vmul.f32 0.25, %v97_v6  ;;  %vm103_vm1 = vcmp.ge.f32.partialorder %v97_v6, 0.0 }
  0xe7   :  { %v99_v8 = vpop.f32.mrf.mxu0 }
  0xe8   :  { %v100_v10 = vadd.f32 %v279_v4, %v99_v8  ;;  %v107_v13 = vsel %vm103_vm1, %v97_v6, %v105_v9 }
  0xe9   :  { %v328_v11 = vpop.f32.mrf.mxu0 }
  0xea   :  { %vm104_vm2 = vcmp.ge.f32.partialorder %v100_v10, 0.0  ;;  %v106_v12 = vmul.f32 0.25, %v100_v10 }
  0xec   :  { %v108_v14 = vsel %vm104_vm2, %v100_v10, %v106_v12 }
  0xed   :  { %v109_v15 = vpack.c.bf16 %v108_v14, %v107_v13 }
  0xef   :  { %346 = vmatmul.mubr.bf16.vlgmr.msra.gmra.mxu1 %v109_v15 }
 0x1af   :  { %v175_v26 = vpop.f32.mrf.mxu1 }
 0x1b0   :  { %v176_v27 = vadd.f32 %v280_v25, %v175_v26 }
 0x1b1   :  { %v347_v28 = vpop.f32.mrf.mxu1 }
 0x1b2   :  { %v184_v30 = vmul.f32 0.25, %v176_v27  ;;  %vm182_vm3 = vcmp.ge.f32.partialorder %v176_v27, 0.0 }
 0x1b3   :  { %v178_v29 = vpop.f32.mrf.mxu1 }
 0x1b4   :  { %v179_v3 = vadd.f32 %v280_v25, %v178_v29  ;;  %v186_v33 = vsel %vm182_vm3, %v176_v27, %v184_v30 }
 0x1b5   :  { %v348_v31 = vpop.f32.mrf.mxu1 }
 0x1b6   :  { %vm183_vm4 = vcmp.ge.f32.partialorder %v179_v3, 0.0  ;;  %v185_v32 = vmul.f32 0.25, %v179_v3 }
 0x1b8   :  { %v187_v34 = vsel %vm183_vm4, %v179_v3, %v185_v32 }
 0x1b9   :  { %v188_v35 = vpack.c.bf16 %v187_v34, %v186_v33 }
 0x1bb   :  { %366 = vmatmul.mubr.bf16.vlgmr.msra.gmra.mxu0 %v188_v35 }
 0x27b   :  { %v254_v37 = vpop.f32.mrf.mxu0 }
 0x27c   :  { %v255_v38 = vadd.f32 %v281_v36, %v254_v37 }
 0x27d   :  { %v367_v39 = vpop.f32.mrf.mxu0 }
 0x27e   :  { %261 = vst [vmem:[#allocation2] sm:$0xff] %v255_v38 }
 0x27f   :  { %v257_v40 = vpop.f32.mrf.mxu0 }
 0x280   :  { %v258_v41 = vadd.f32 %v281_v36, %v257_v40 }
 0x281   :  { %v368_v42 = vpop.f32.mrf.mxu0 }
 0x282   :  { %262 = vst [vmem:[#allocation2 + $0x8] sm:$0xff] %v258_v41 }
 0x283   :  { %385 = shalt.err (!%p382_p4)
}
 0x284   :  { %s399_s9 = smov 128   ;;  %s400_s6 = smov 8  }
 0x285   :  { %274 = dma.vmem_to_hbm [thread:$0]  %s269_s30, 256, %s640_s7, [#allocation3], %s399_s9, %s399_s9, %s400_s6  }
 0x286   :  { %394 = dma.done.wait [#allocation3], 256  }
 0x287   :  { %395 = vsyncadd [#allocation3], 4294967040 }
 0x288   :  { %278 = vsyncpa [#allocation3], 1 }

</bundles_post_ra>
